<compile_context>
chip_gen: v7x
topology: tpu7x:2x2x1
jax: 0.10.0
libtpu: 0.0.40
codegen_flags: <defaults>
</compile_context>

<pallas_src>
import functools

import numpy as np
import jax
import jax.numpy as jnp
from jax import lax
from jax.experimental import pallas as pl
from jax.experimental.pallas import tpu as pltpu

EPS = 1e-5                    # nn.BatchNorm2d default eps
DOT_DTYPE = jnp.bfloat16      # MXU operand dtype (accumulation is always f32)
ACT_DTYPE = jnp.bfloat16      # inter-stage activation slabs in HBM


# ----------------------------- in-kernel helpers --------------------------- #

def _bn_stats_apply(y, mask, g, b, n_valid):
    """Training-mode BatchNorm on a (C, M) f32 slab with single-pass *masked* statistics.
    mask is (1, M) with ones at valid (interior) columns; n_valid = number of valid columns."""
    ym = y * mask
    s1 = jnp.sum(ym, axis=1, keepdims=True)           # sum over valid columns
    s2 = jnp.sum(ym * y, axis=1, keepdims=True)       # sum of squares over valid columns
    inv_n = 1.0 / n_valid
    mean = s1 * inv_n
    var = jnp.maximum(s2 * inv_n - mean * mean, 0.0)  # biased variance, clamped
    scale = g * lax.rsqrt(var + EPS)
    return y * scale + (b - mean * scale)


# ----------------------------- Pallas kernels ------------------------------ #

def _conv1x1_bn_relu_kernel(x_ref, w_ref, m_ref, g_ref, b_ref, o_ref, *, n_valid):
    # conv1 + bn1 + relu.  Output is re-masked so halo / padding columns stay exactly zero
    # (conv2 reads them through its shifted windows).
    y = jnp.dot(w_ref[...], x_ref[...], preferred_element_type=jnp.float32)
    y = _bn_stats_apply(y, m_ref[...], g_ref[...], b_ref[...], n_valid)
    o_ref[...] = (jnp.maximum(y, 0.0) * m_ref[...]).astype(o_ref.dtype)


def _conv3x3_bn_relu_kernel(ph_ref, w_ref, m_ref, g_ref, b_ref, o_ref,
                            *, stride, wo_dim, halo, n_valid):
    # conv2 (3x3, pad=1, stride s) + bn2 + relu, fully fused.
    # ph_ref: (s*s, Cin, halo + Mp + halo) zero-padded phase slabs (padded-pitch layout).
    # w_ref:  (Cout_tile, 9*Cin) stacked tap weights, tap-major (k = kh*3 + kw).
    # Garbage at padding-position outputs is fine: BN stats are masked and conv3 is 1x1.
    s = stride
    mp = o_ref.shape[1]
    pitch = wo_dim + 2
    wins = []
    for kh in range(3):
        for kw in range(3):
            ph, pw = (kh - 1) % s, (kw - 1) % s
            oh, ow = (kh - 1 - ph) // s, (kw - 1 - pw) // s
            delta = oh * pitch + ow
            # constant-shift lane window of phase (ph, pw); f32 so each Cin-row piece is
            # sublane-tile aligned for the concatenate below.
            wins.append(ph_ref[ph * s + pw, :, pl.ds(halo + delta, mp)].astype(jnp.float32))
    xcat = jnp.concatenate(wins, axis=0).astype(DOT_DTYPE)        # (9*Cin, Mp)
    y = jnp.dot(w_ref[...], xcat, preferred_element_type=jnp.float32)
    y = _bn_stats_apply(y, m_ref[...], g_ref[...], b_ref[...], n_valid)
    o_ref[...] = jnp.maximum(y, 0.0).astype(o_ref.dtype)


def _conv1x1_bn_add_relu_kernel(x_ref, w_ref, m_ref, g_ref, b_ref, r_ref, o_ref, *, n_valid):
    # conv3 + bn3 + identity-residual add (f32) + relu.
    y = jnp.dot(w_ref[...], x_ref[...], preferred_element_type=jnp.float32)
    y = _bn_stats_apply(y, m_ref[...], g_ref[...], b_ref[...], n_valid)
    o_ref[...] = jnp.maximum(y + r_ref[...], 0.0)


def _conv1x1_bn_ds_add_relu_kernel(x_ref, w_ref, m_ref, g_ref, b_ref,
                                   xd_ref, wd_ref, gd_ref, bd_ref, o_ref, *, n_valid):
    # conv3 + bn3 + (downsample 1x1 conv + BN) residual + add + relu.
    y = jnp.dot(w_ref[...], x_ref[...], preferred_element_type=jnp.float32)
    y = _bn_stats_apply(y, m_ref[...], g_ref[...], b_ref[...], n_valid)
    r = jnp.dot(wd_ref[...], xd_ref[...], preferred_element_type=jnp.float32)
    r = _bn_stats_apply(r, m_ref[...], gd_ref[...], bd_ref[...], n_valid)
    o_ref[...] = jnp.maximum(y + r, 0.0)


# ----------------------------- pallas_call wrapper -------------------------- #

def _cout_tile(c):
    for t in (256, 128):
        if c >= t and c % t == 0:
            return t
    return c                       # small channel counts: whole Cout in one tile


def _stage_call(kernel, operands, out_shape, out_dtype, co_tile):
    """One fused conv stage.  operands: list of (array, kind); kind == 'tile' is tiled over the
    Cout grid along dim 0, kind == 'full' stays resident (constant index_map)."""
    cout = out_shape[0]
    assert cout % co_tile == 0
    grid = (cout // co_tile,)

    in_specs, args = [], []
    for arr, kind in operands:
        args.append(arr)
        if kind == 'tile':
            bs = (co_tile,) + tuple(arr.shape[1:])
            in_specs.append(pl.BlockSpec(bs, lambda i, _n=arr.ndim: (i,) + (0,) * (_n - 1)))
        else:
            in_specs.append(pl.BlockSpec(tuple(arr.shape),
                                         lambda i, _n=arr.ndim: (0,) * _n))
    out_spec = pl.BlockSpec((co_tile,) + tuple(out_shape[1:]),
                            lambda i, _n=len(out_shape): (i,) + (0,) * (_n - 1))

    # Rough resident-VMEM guard (x2 for double buffering).
    # TODO(synk): large shapes need an M-tiled grid with BN-stat accumulation across M tiles.
    resident = sum(int(np.prod(a.shape)) * a.dtype.itemsize for a, k in operands if k == 'full')
    tiles = sum(int(np.prod((co_tile,) + tuple(a.shape[1:]))) * a.dtype.itemsize
                for a, k in operands if k == 'tile')
    tiles += int(np.prod((co_tile,) + tuple(out_shape[1:]))) * np.dtype(out_dtype).itemsize
    assert 2 * (resident + tiles) < 24 * 1024 * 1024, "slab too large for this whole-M design"

    return pl.pallas_call(
        kernel,
        out_shape=jax.ShapeDtypeStruct(out_shape, out_dtype),
        grid=grid,
        in_specs=in_specs,
        out_specs=out_spec,
        compiler_params=pltpu.CompilerParams(
            dimension_semantics=("parallel",),
            vmem_limit_bytes=32 * 1024 * 1024),
    )(*args)


# ----------------------------- plain-JAX layout glue ------------------------ #

def _valid_mask(n, hq, wq, halo):
    """(1, halo + n*(hq+2)*(wq+2) + halo) f32 mask of the valid (interior) pixel positions."""
    m = np.zeros((n, hq + 2, wq + 2), np.float32)
    m[:, 1:-1, 1:-1] = 1.0
    m = m.reshape(1, -1)
    if halo:
        m = np.pad(m, ((0, 0), (halo, halo)))
    return m


def _to_padded_slab(x_nchw, halo, dtype):
    """(N, C, H, W) -> (C, halo + N*(H+2)*(W+2) + halo) padded-pitch lane-dense slab."""
    c = x_nchw.shape[1]
    xs = jnp.transpose(x_nchw, (1, 0, 2, 3))
    xs = jnp.pad(xs, ((0, 0), (0, 0), (1, 1), (1, 1))).reshape(c, -1)
    if halo:
        xs = jnp.pad(xs, ((0, 0), (halo, halo)))
    return xs.astype(dtype)


# ----------------------------- Bottleneck forward --------------------------- #

def bottleneck_forward(params, x_nchw, *, stride=1):
    """Forward of torch `Bottleneck` (training-mode BatchNorm). x: (N, Cin, H, W) f32."""
    n, cin, h, w = x_nchw.shape
    s = stride
    assert h % s == 0 and w % s == 0
    ho, wo = h // s, w // s
    planes = params['w1'].shape[0]
    c4 = params['w3'].shape[0]
    assert cin % 8 == 0 and planes % 8 == 0       # sublane-aligned window concat in conv2

    halo1 = w + 3                                 # conv2 lane halo (== wo+3 when s == 1)
    mp1 = n * (h + 2) * (w + 2)                   # conv1 padded-pitch width
    halo2 = wo + 3
    mp2 = n * (ho + 2) * (wo + 2)                 # conv2/conv3 padded-pitch width

    # Layout glue (plain JAX): channel-major, padded-pitch, lane-dense slabs.
    x_slab = _to_padded_slab(x_nchw, halo1, ACT_DTYPE)            # (Cin, halo+Mp1+halo) bf16
    mask1 = jnp.asarray(_valid_mask(n, h, w, halo1))              # (1, halo+Mp1+halo)
    mask2 = jnp.asarray(_valid_mask(n, ho, wo, 0))                # (1, Mp2)
    n_valid1 = n * h * w
    n_valid2 = n * ho * wo
    co1 = _cout_tile(planes)
    co3 = _cout_tile(c4)

    # --- conv1 (1x1) + bn1 + relu : one fused pallas_call ------------------- #
    y1 = _stage_call(
        functools.partial(_conv1x1_bn_relu_kernel, n_valid=n_valid1),
        [(x_slab, 'full'), (params['w1'], 'tile'), (mask1, 'full'),
         (params['g1'], 'tile'), (params['b1'], 'tile')],
        (planes, x_slab.shape[1]), ACT_DTYPE, co1)

    # --- conv2 (3x3, stride s, pad 1) + bn2 + relu : one fused pallas_call -- #
    if s == 1:
        phases = y1[None]          # conv1 output already has the halo-padded layout: zero glue
    else:
        # TODO(synk): the s*s phase split of y1 is thin plain-JAX glue (one activation copy in
        # HBM); it could be folded into conv1's out_spec for a fully glue-free strided path.
        y1_pix = y1[:, halo1:halo1 + mp1].reshape(planes, n, h + 2, w + 2)[:, :, 1:-1, 1:-1]
        y1_pad = jnp.pad(y1_pix, ((0, 0), (0, 0), (s, s), (s, s)))
        phases = jnp.stack(
            [y1_pad[:, :, ph::s, pw::s].reshape(planes, mp2)
             for ph in range(s) for pw in range(s)], axis=0)
        phases = jnp.pad(phases, ((0, 0), (0, 0), (halo2, halo2)))
    k2 = functools.partial(_conv3x3_bn_relu_kernel, stride=s, wo_dim=wo,
                           halo=halo2, n_valid=n_valid2)
    y2 = _stage_call(
        k2,
        [(phases, 'full'), (params['w2'], 'tile'), (mask2, 'full'),
         (params['g2'], 'tile'), (params['b2'], 'tile')],
        (planes, mp2), ACT_DTYPE, co1)

    # --- conv3 (1x1) + bn3 + residual (+ downsample conv+BN) + relu ---------- #
    if 'wd' in params:
        xd = jnp.transpose(x_nchw[:, :, ::s, ::s], (1, 0, 2, 3))
        xd = jnp.pad(xd, ((0, 0), (0, 0), (1, 1), (1, 1))).reshape(cin, mp2).astype(ACT_DTYPE)
        out = _stage_call(
            functools.partial(_conv1x1_bn_ds_add_relu_kernel, n_valid=n_valid2),
            [(y2, 'full'), (params['w3'], 'tile'), (mask2, 'full'),
             (params['g3'], 'tile'), (params['b3'], 'tile'),
             (xd, 'full'), (params['wd'], 'tile'),
             (params['gd'], 'tile'), (params['bd'], 'tile')],
            (c4, mp2), jnp.float32, co3)
    else:
        assert s == 1 and cin == c4
        x_res = _to_padded_slab(x_nchw, 0, jnp.float32)           # identity residual kept f32
        out = _stage_call(
            functools.partial(_conv1x1_bn_add_relu_kernel, n_valid=n_valid2),
            [(y2, 'full'), (params['w3'], 'tile'), (mask2, 'full'),
             (params['g3'], 'tile'), (params['b3'], 'tile'), (x_res, 'tile')],
            (c4, mp2), jnp.float32, co3)

    out = out.reshape(c4, n, ho + 2, wo + 2)[:, :, 1:-1, 1:-1]    # drop padding ring
    return jnp.transpose(out, (1, 0, 2, 3))                       # back to NCHW


# ----------------------------- params & pure-JAX reference ------------------ #

def init_bottleneck_params(key, inplanes, planes, stride):
    c4 = planes * 4
    ks = jax.random.split(key, 8)

    def conv(k, cout, cin, ksz):
        fan = cin * ksz * ksz
        return jax.random.normal(k, (cout, cin, ksz, ksz), jnp.float32) * np.sqrt(2.0 / fan)

    def bn(k, c):
        kg, kb = jax.random.split(k)
        return (1.0 + 0.1 * jax.random.normal(kg, (c, 1), jnp.float32),
                0.1 * jax.random.normal(kb, (c, 1), jnp.float32))

    p, refw = {}, {}
    w1 = conv(ks[0], planes, inplanes, 1); refw['w1'] = w1
    p['w1'] = w1.reshape(planes, inplanes).astype(DOT_DTYPE)
    p['g1'], p['b1'] = bn(ks[1], planes)
    w2 = conv(ks[2], planes, planes, 3); refw['w2'] = w2
    # stacked tap-major weight: (Cout, KH, KW, Cin) -> (Cout, 9*Cin)
    p['w2'] = jnp.transpose(w2, (0, 2, 3, 1)).reshape(planes, 9 * planes).astype(DOT_DTYPE)
    p['g2'], p['b2'] = bn(ks[3], planes)
    w3 = conv(ks[4], c4, planes, 1); refw['w3'] = w3
    p['w3'] = w3.reshape(c4, planes).astype(DOT_DTYPE)
    p['g3'], p['b3'] = bn(ks[5], c4)
    if stride != 1 or inplanes != c4:
        wd = conv(ks[6], c4, inplanes, 1); refw['wd'] = wd
        p['wd'] = wd.reshape(c4, inplanes).astype(DOT_DTYPE)
        p['gd'], p['bd'] = bn(ks[7], c4)
    return p, refw


def _conv_ref(x, w, stride, pad):
    return lax.conv_general_dilated(x, w, (stride, stride), ((pad, pad), (pad, pad)),
                                    dimension_numbers=('NCHW', 'OIHW', 'NCHW'))


def _bn_ref(y, g, b):
    mean = jnp.mean(y, axis=(0, 2, 3), keepdims=True)
    var = jnp.mean(jnp.square(y - mean), axis=(0, 2, 3), keepdims=True)
    return (y - mean) * lax.rsqrt(var + EPS) * g.reshape(1, -1, 1, 1) + b.reshape(1, -1, 1, 1)


def bottleneck_ref(p, refw, x, stride):
    out = jax.nn.relu(_bn_ref(_conv_ref(x, refw['w1'], 1, 0), p['g1'], p['b1']))
    out = jax.nn.relu(_bn_ref(_conv_ref(out, refw['w2'], stride, 1), p['g2'], p['b2']))
    out = _bn_ref(_conv_ref(out, refw['w3'], 1, 0), p['g3'], p['b3'])
    if 'wd' in refw:
        residual = _bn_ref(_conv_ref(x, refw['wd'], stride, 0), p['gd'], p['bd'])
    else:
        residual = x
    return jax.nn.relu(out + residual)


# ----------------------------- main ----------------------------------------- #

if __name__ == "__main__":
    key = jax.random.PRNGKey(0)
    kx, kp1, kp2 = jax.random.split(key, 3)

    x = jax.random.normal(kx, (2, 32, 16, 16), jnp.float32)   # NCHW

    # Case A: stride=1, identity residual (inplanes == planes * expansion)
    params_a, refw_a = init_bottleneck_params(kp1, inplanes=32, planes=8, stride=1)
    fwd_a = jax.jit(functools.partial(bottleneck_forward, stride=1))
    out_a = jax.block_until_ready(fwd_a(params_a, x))
    assert out_a.shape == (2, 32, 16, 16) and out_a.dtype == jnp.float32

    # Case B: stride=2 with 1x1-conv + BN downsample on the residual
    params_b, refw_b = init_bottleneck_params(kp2, inplanes=32, planes=8, stride=2)
    fwd_b = jax.jit(functools.partial(bottleneck_forward, stride=2))
    out_b = jax.block_until_ready(fwd_b(params_b, x))
    assert out_b.shape == (2, 32, 8, 8) and out_b.dtype == jnp.float32

    # Correctness vs. a pure-JAX float32 reference.  Tolerance is deliberately loose because the
    # kernel uses bf16 MXU operands AND bf16 inter-stage activation slabs (training-style
    # precision); structural bugs would show as O(1) errors, not a few percent.
    ref_a = bottleneck_ref(params_a, refw_a, x, 1)
    ref_b = bottleneck_ref(params_b, refw_b, x, 2)
    err_a = float(jnp.max(jnp.abs(out_a - ref_a)))
    err_b = float(jnp.max(jnp.abs(out_b - ref_b)))
    rel_a = float(jnp.linalg.norm(out_a - ref_a) / (jnp.linalg.norm(ref_a) + 1e-9))
    rel_b = float(jnp.linalg.norm(out_b - ref_b) / (jnp.linalg.norm(ref_b) + 1e-9))
    assert err_a < 2e-1 and err_b < 2e-1, (err_a, err_b)
    assert rel_a < 3e-2 and rel_b < 3e-2, (rel_a, rel_b)

    print("KERNEL_OK")
</pallas_src>

<mosaic_0001>
module attributes {stable_mosaic.version = 11 : i64} {
  func.func @_conv1x1_bn_relu_kernel(%arg0: i32, %arg1: memref<32x686xbf16, #tpu.memory_space<vmem>>, %arg2: memref<8x32xbf16, #tpu.memory_space<vmem>>, %arg3: memref<1x686xf32, #tpu.memory_space<vmem>>, %arg4: memref<8x1xf32, #tpu.memory_space<vmem>>, %arg5: memref<8x1xf32, #tpu.memory_space<vmem>>, %arg6: memref<8x686xbf16, #tpu.memory_space<vmem>>) attributes {dimension_semantics = [#tpu.dimension_semantics<parallel>], iteration_bounds = array<i64: 1>, scalar_prefetch = 0 : i64, scratch_operands = 0 : i64, tpu.core_type = #tpu.core_type<tc>, window_params = [{pipeline_mode = #tpu.pipeline_mode<synchronous>, transform_indices = @transform_0, window_bounds = array<i64: 32, 686>}, {transform_indices = @transform_1, window_bounds = array<i64: 8, 32>}, {pipeline_mode = #tpu.pipeline_mode<synchronous>, transform_indices = @transform_2, window_bounds = array<i64: 1, 686>}, {transform_indices = @transform_3, window_bounds = array<i64: 8, 1>}, {transform_indices = @transform_4, window_bounds = array<i64: 8, 1>}, {transform_indices = @transform_5, window_bounds = array<i64: 8, 686>}]} {
    %c0 = arith.constant 0 : index
    %c0_0 = arith.constant 0 : index
    %0 = vector.load %arg2[%c0, %c0_0] : memref<8x32xbf16, #tpu.memory_space<vmem>>, vector<8x32xbf16>
    %c0_1 = arith.constant 0 : index
    %c0_2 = arith.constant 0 : index
    %1 = vector.load %arg1[%c0_1, %c0_2] : memref<32x686xbf16, #tpu.memory_space<vmem>>, vector<32x686xbf16>
    %cst = arith.constant dense<0.000000e+00> : vector<8x686xf32>
    %2 = tpu.matmul %0, %1, %cst {dimension_numbers = #tpu.dot_dimension_numbers<[1], [0], [0], [1], [0, 0, 1, 1], [], []>} : vector<8x32xbf16>, vector<32x686xbf16>, vector<8x686xf32> -> vector<8x686xf32>
    %c0_3 = arith.constant 0 : index
    %c0_4 = arith.constant 0 : index
    %3 = vector.load %arg3[%c0_3, %c0_4] : memref<1x686xf32, #tpu.memory_space<vmem>>, vector<1x686xf32>
    %c0_5 = arith.constant 0 : index
    %c0_6 = arith.constant 0 : index
    %4 = vector.load %arg4[%c0_5, %c0_6] : memref<8x1xf32, #tpu.memory_space<vmem>>, vector<8x1xf32>
    %c0_7 = arith.constant 0 : index
    %c0_8 = arith.constant 0 : index
    %5 = vector.load %arg5[%c0_7, %c0_8] : memref<8x1xf32, #tpu.memory_space<vmem>>, vector<8x1xf32>
    %6 = vector.broadcast %3 : vector<1x686xf32> to vector<8x686xf32>
    %7 = arith.mulf %2, %6 : vector<8x686xf32>
    %cst_9 = arith.constant dense<0.000000e+00> : vector<8xf32>
    %8 = vector.multi_reduction <add>, %7, %cst_9 [1] : vector<8x686xf32> to vector<8xf32>
    %9 = vector.shape_cast %8 : vector<8xf32> to vector<8x1xf32>
    %10 = arith.mulf %7, %2 : vector<8x686xf32>
    %cst_10 = arith.constant dense<0.000000e+00> : vector<8xf32>
    %11 = vector.multi_reduction <add>, %10, %cst_10 [1] : vector<8x686xf32> to vector<8xf32>
    %12 = vector.shape_cast %11 : vector<8xf32> to vector<8x1xf32>
    %cst_11 = arith.constant 0.001953125 : f32
    %13 = vector.broadcast %cst_11 : f32 to vector<8x1xf32>
    %14 = arith.mulf %9, %13 : vector<8x1xf32>
    %cst_12 = arith.constant 0.001953125 : f32
    %15 = vector.broadcast %cst_12 : f32 to vector<8x1xf32>
    %16 = arith.mulf %12, %15 : vector<8x1xf32>
    %17 = arith.mulf %14, %14 : vector<8x1xf32>
    %18 = arith.subf %16, %17 : vector<8x1xf32>
    %cst_13 = arith.constant 0.000000e+00 : f32
    %19 = vector.broadcast %cst_13 : f32 to vector<8x1xf32>
    %20 = arith.maximumf %18, %19 : vector<8x1xf32>
    %cst_14 = arith.constant 9.99999974E-6 : f32
    %21 = vector.broadcast %cst_14 : f32 to vector<8x1xf32>
    %22 = arith.addf %20, %21 : vector<8x1xf32>
    %23 = math.rsqrt %22 : vector<8x1xf32>
    %24 = arith.mulf %4, %23 : vector<8x1xf32>
    %25 = vector.broadcast %24 : vector<8x1xf32> to vector<8x686xf32>
    %26 = arith.mulf %2, %25 : vector<8x686xf32>
    %27 = arith.mulf %14, %24 : vector<8x1xf32>
    %28 = arith.subf %5, %27 : vector<8x1xf32>
    %29 = vector.broadcast %28 : vector<8x1xf32> to vector<8x686xf32>
    %30 = arith.addf %26, %29 : vector<8x686xf32>
    %cst_15 = arith.constant 0.000000e+00 : f32
    %31 = vector.broadcast %cst_15 : f32 to vector<8x686xf32>
    %32 = arith.maximumf %30, %31 : vector<8x686xf32>
    %c0_16 = arith.constant 0 : index
    %c0_17 = arith.constant 0 : index
    %33 = vector.load %arg3[%c0_16, %c0_17] : memref<1x686xf32, #tpu.memory_space<vmem>>, vector<1x686xf32>
    %34 = vector.broadcast %33 : vector<1x686xf32> to vector<8x686xf32>
    %35 = arith.mulf %32, %34 : vector<8x686xf32>
    %36 = arith.truncf %35 : vector<8x686xf32> to vector<8x686xbf16>
    %c0_18 = arith.constant 0 : index
    %c0_19 = arith.constant 0 : index
    %37 = vector.load %arg6[%c0_18, %c0_19] : memref<8x686xbf16, #tpu.memory_space<vmem>>, vector<8x686xbf16>
    tpu.vector_store %arg6[%c0_18, %c0_19], %36 {strides = array<i32>} : memref<8x686xbf16, #tpu.memory_space<vmem>>, vector<8x686xbf16>,
    return
  }
  func.func @transform_0(%arg0: i32) -> (i32, i32) {
    %c0_i32 = arith.constant 0 : i32
    %c0_i32_0 = arith.constant 0 : i32
    %c0_i32_1 = arith.constant 0 : i32
    return %c0_i32, %c0_i32_0 : i32, i32
  }
  func.func @transform_1(%arg0: i32) -> (i32, i32) {
    %c0_i32 = arith.constant 0 : i32
    %c0_i32_0 = arith.constant 0 : i32
    return %arg0, %c0_i32 : i32, i32
  }
  func.func @transform_2(%arg0: i32) -> (i32, i32) {
    %c0_i32 = arith.constant 0 : i32
    %c0_i32_0 = arith.constant 0 : i32
    %c0_i32_1 = arith.constant 0 : i32
    return %c0_i32, %c0_i32_0 : i32, i32
  }
  func.func @transform_3(%arg0: i32) -> (i32, i32) {
    %c0_i32 = arith.constant 0 : i32
    %c0_i32_0 = arith.constant 0 : i32
    return %arg0, %c0_i32 : i32, i32
  }
  func.func @transform_4(%arg0: i32) -> (i32, i32) {
    %c0_i32 = arith.constant 0 : i32
    %c0_i32_0 = arith.constant 0 : i32
    return %arg0, %c0_i32 : i32, i32
  }
  func.func @transform_5(%arg0: i32) -> (i32, i32) {
    %c0_i32 = arith.constant 0 : i32
    %c0_i32_0 = arith.constant 0 : i32
    return %arg0, %c0_i32 : i32, i32
  }
}

module attributes {stable_mosaic.version = 11 : i64} {
  func.func @_conv3x3_bn_relu_kernel(%arg0: i32, %arg1: memref<1x8x686xbf16, #tpu.memory_space<vmem>>, %arg2: memref<8x72xbf16, #tpu.memory_space<vmem>>, %arg3: memref<1x648xf32, #tpu.memory_space<vmem>>, %arg4: memref<8x1xf32, #tpu.memory_space<vmem>>, %arg5: memref<8x1xf32, #tpu.memory_space<vmem>>, %arg6: memref<8x648xbf16, #tpu.memory_space<vmem>>) attributes {dimension_semantics = [#tpu.dimension_semantics<parallel>], iteration_bounds = array<i64: 1>, scalar_prefetch = 0 : i64, scratch_operands = 0 : i64, tpu.core_type = #tpu.core_type<tc>, window_params = [{pipeline_mode = #tpu.pipeline_mode<synchronous>, transform_indices = @transform_0, window_bounds = array<i64: 1, 8, 686>}, {transform_indices = @transform_1, window_bounds = array<i64: 8, 72>}, {pipeline_mode = #tpu.pipeline_mode<synchronous>, transform_indices = @transform_2, window_bounds = array<i64: 1, 648>}, {transform_indices = @transform_3, window_bounds = array<i64: 8, 1>}, {transform_indices = @transform_4, window_bounds = array<i64: 8, 1>}, {transform_indices = @transform_5, window_bounds = array<i64: 8, 648>}]} {
    %c0 = arith.constant 0 : index
    %c0_0 = arith.constant 0 : index
    %c0_1 = arith.constant 0 : index
    %0 = vector.load %arg1[%c0, %c0_0, %c0_1] : memref<1x8x686xbf16, #tpu.memory_space<vmem>>, vector<1x8x648xbf16>
    %1 = vector.shape_cast %0 : vector<1x8x648xbf16> to vector<8x648xbf16>
    %2 = arith.extf %1 : vector<8x648xbf16> to vector<8x648xf32>
    %c0_2 = arith.constant 0 : index
    %c0_3 = arith.constant 0 : index
    %c1 = arith.constant 1 : index
    %3 = vector.load %arg1[%c0_2, %c0_3, %c1] : memref<1x8x686xbf16, #tpu.memory_space<vmem>>, vector<1x8x648xbf16>
    %4 = vector.shape_cast %3 : vector<1x8x648xbf16> to vector<8x648xbf16>
    %5 = arith.extf %4 : vector<8x648xbf16> to vector<8x648xf32>
    %c0_4 = arith.constant 0 : index
    %c0_5 = arith.constant 0 : index
    %c2 = arith.constant 2 : index
    %6 = vector.load %arg1[%c0_4, %c0_5, %c2] : memref<1x8x686xbf16, #tpu.memory_space<vmem>>, vector<1x8x648xbf16>
    %7 = vector.shape_cast %6 : vector<1x8x648xbf16> to vector<8x648xbf16>
    %8 = arith.extf %7 : vector<8x648xbf16> to vector<8x648xf32>
    %c0_6 = arith.constant 0 : index
    %c0_7 = arith.constant 0 : index
    %c18 = arith.constant 18 : index
    %9 = vector.load %arg1[%c0_6, %c0_7, %c18] : memref<1x8x686xbf16, #tpu.memory_space<vmem>>, vector<1x8x648xbf16>
    %10 = vector.shape_cast %9 : vector<1x8x648xbf16> to vector<8x648xbf16>
    %11 = arith.extf %10 : vector<8x648xbf16> to vector<8x648xf32>
    %c0_8 = arith.constant 0 : index
    %c0_9 = arith.constant 0 : index
    %c19 = arith.constant 19 : index
    %12 = vector.load %arg1[%c0_8, %c0_9, %c19] : memref<1x8x686xbf16, #tpu.memory_space<vmem>>, vector<1x8x648xbf16>
    %13 = vector.shape_cast %12 : vector<1x8x648xbf16> to vector<8x648xbf16>
    %14 = arith.extf %13 : vector<8x648xbf16> to vector<8x648xf32>
    %c0_10 = arith.constant 0 : index
    %c0_11 = arith.constant 0 : index
    %c20 = arith.constant 20 : index
    %15 = vector.load %arg1[%c0_10, %c0_11, %c20] : memref<1x8x686xbf16, #tpu.memory_space<vmem>>, vector<1x8x648xbf16>
    %16 = vector.shape_cast %15 : vector<1x8x648xbf16> to vector<8x648xbf16>
    %17 = arith.extf %16 : vector<8x648xbf16> to vector<8x648xf32>
    %c0_12 = arith.constant 0 : index
    %c0_13 = arith.constant 0 : index
    %c36 = arith.constant 36 : index
    %18 = vector.load %arg1[%c0_12, %c0_13, %c36] : memref<1x8x686xbf16, #tpu.memory_space<vmem>>, vector<1x8x648xbf16>
    %19 = vector.shape_cast %18 : vector<1x8x648xbf16> to vector<8x648xbf16>
    %20 = arith.extf %19 : vector<8x648xbf16> to vector<8x648xf32>
    %c0_14 = arith.constant 0 : index
    %c0_15 = arith.constant 0 : index
    %c37 = arith.constant 37 : index
    %21 = vector.load %arg1[%c0_14, %c0_15, %c37] : memref<1x8x686xbf16, #tpu.memory_space<vmem>>, vector<1x8x648xbf16>
    %22 = vector.shape_cast %21 : vector<1x8x648xbf16> to vector<8x648xbf16>
    %23 = arith.extf %22 : vector<8x648xbf16> to vector<8x648xf32>
    %c0_16 = arith.constant 0 : index
    %c0_17 = arith.constant 0 : index
    %c38 = arith.constant 38 : index
    %24 = vector.load %arg1[%c0_16, %c0_17, %c38] : memref<1x8x686xbf16, #tpu.memory_space<vmem>>, vector<1x8x648xbf16>
    %25 = vector.shape_cast %24 : vector<1x8x648xbf16> to vector<8x648xbf16>
    %26 = arith.extf %25 : vector<8x648xbf16> to vector<8x648xf32>
    %27 = tpu.concatenate %2, %5, %8, %11, %14, %17, %20, %23, %26 in 0 : vector<8x648xf32>, vector<8x648xf32>, vector<8x648xf32>, vector<8x648xf32>, vector<8x648xf32>, vector<8x648xf32>, vector<8x648xf32>, vector<8x648xf32>, vector<8x648xf32> -> vector<72x648xf32>
    %28 = arith.truncf %27 : vector<72x648xf32> to vector<72x648xbf16>
    %c0_18 = arith.constant 0 : index
    %c0_19 = arith.constant 0 : index
    %29 = vector.load %arg2[%c0_18, %c0_19] : memref<8x72xbf16, #tpu.memory_space<vmem>>, vector<8x72xbf16>
    %cst = arith.constant dense<0.000000e+00> : vector<8x648xf32>
    %30 = tpu.matmul %29, %28, %cst {dimension_numbers = #tpu.dot_dimension_numbers<[1], [0], [0], [1], [0, 0, 1, 1], [], []>} : vector<8x72xbf16>, vector<72x648xbf16>, vector<8x648xf32> -> vector<8x648xf32>
    %c0_20 = arith.constant 0 : index
    %c0_21 = arith.constant 0 : index
    %31 = vector.load %arg3[%c0_20, %c0_21] : memref<1x648xf32, #tpu.memory_space<vmem>>, vector<1x648xf32>
    %c0_22 = arith.constant 0 : index
    %c0_23 = arith.constant 0 : index
    %32 = vector.load %arg4[%c0_22, %c0_23] : memref<8x1xf32, #tpu.memory_space<vmem>>, vector<8x1xf32>
    %c0_24 = arith.constant 0 : index
    %c0_25 = arith.constant 0 : index
    %33 = vector.load %arg5[%c0_24, %c0_25] : memref<8x1xf32, #tpu.memory_space<vmem>>, vector<8x1xf32>
    %34 = vector.broadcast %31 : vector<1x648xf32> to vector<8x648xf32>
    %35 = arith.mulf %30, %34 : vector<8x648xf32>
    %cst_26 = arith.constant dense<0.000000e+00> : vector<8xf32>
    %36 = vector.multi_reduction <add>, %35, %cst_26 [1] : vector<8x648xf32> to vector<8xf32>
    %37 = vector.shape_cast %36 : vector<8xf32> to vector<8x1xf32>
    %38 = arith.mulf %35, %30 : vector<8x648xf32>
    %cst_27 = arith.constant dense<0.000000e+00> : vector<8xf32>
    %39 = vector.multi_reduction <add>, %38, %cst_27 [1] : vector<8x648xf32> to vector<8xf32>
    %40 = vector.shape_cast %39 : vector<8xf32> to vector<8x1xf32>
    %cst_28 = arith.constant 0.001953125 : f32
    %41 = vector.broadcast %cst_28 : f32 to vector<8x1xf32>
    %42 = arith.mulf %37, %41 : vector<8x1xf32>
    %cst_29 = arith.constant 0.001953125 : f32
    %43 = vector.broadcast %cst_29 : f32 to vector<8x1xf32>
    %44 = arith.mulf %40, %43 : vector<8x1xf32>
    %45 = arith.mulf %42, %42 : vector<8x1xf32>
    %46 = arith.subf %44, %45 : vector<8x1xf32>
    %cst_30 = arith.constant 0.000000e+00 : f32
    %47 = vector.broadcast %cst_30 : f32 to vector<8x1xf32>
    %48 = arith.maximumf %46, %47 : vector<8x1xf32>
    %cst_31 = arith.constant 9.99999974E-6 : f32
    %49 = vector.broadcast %cst_31 : f32 to vector<8x1xf32>
    %50 = arith.addf %48, %49 : vector<8x1xf32>
    %51 = math.rsqrt %50 : vector<8x1xf32>
    %52 = arith.mulf %32, %51 : vector<8x1xf32>
    %53 = vector.broadcast %52 : vector<8x1xf32> to vector<8x648xf32>
    %54 = arith.mulf %30, %53 : vector<8x648xf32>
    %55 = arith.mulf %42, %52 : vector<8x1xf32>
    %56 = arith.subf %33, %55 : vector<8x1xf32>
    %57 = vector.broadcast %56 : vector<8x1xf32> to vector<8x648xf32>
    %58 = arith.addf %54, %57 : vector<8x648xf32>
    %cst_32 = arith.constant 0.000000e+00 : f32
    %59 = vector.broadcast %cst_32 : f32 to vector<8x648xf32>
    %60 = arith.maximumf %58, %59 : vector<8x648xf32>
    %61 = arith.truncf %60 : vector<8x648xf32> to vector<8x648xbf16>
    %c0_33 = arith.constant 0 : index
    %c0_34 = arith.constant 0 : index
    %62 = vector.load %arg6[%c0_33, %c0_34] : memref<8x648xbf16, #tpu.memory_space<vmem>>, vector<8x648xbf16>
    tpu.vector_store %arg6[%c0_33, %c0_34], %61 {strides = array<i32>} : memref<8x648xbf16, #tpu.memory_space<vmem>>, vector<8x648xbf16>,
    return
  }
  func.func @transform_0(%arg0: i32) -> (i32, i32, i32) {
    %c0_i32 = arith.constant 0 : i32
    %c0_i32_0 = arith.constant 0 : i32
    %c0_i32_1 = arith.constant 0 : i32
    %c0_i32_2 = arith.constant 0 : i32
    return %c0_i32, %c0_i32_0, %c0_i32_1 : i32, i32, i32
  }
  func.func @transform_1(%arg0: i32) -> (i32, i32) {
    %c0_i32 = arith.constant 0 : i32
    %c0_i32_0 = arith.constant 0 : i32
    return %arg0, %c0_i32 : i32, i32
  }
  func.func @transform_2(%arg0: i32) -> (i32, i32) {
    %c0_i32 = arith.constant 0 : i32
    %c0_i32_0 = arith.constant 0 : i32
    %c0_i32_1 = arith.constant 0 : i32
    return %c0_i32, %c0_i32_0 : i32, i32
  }
  func.func @transform_3(%arg0: i32) -> (i32, i32) {
    %c0_i32 = arith.constant 0 : i32
    %c0_i32_0 = arith.constant 0 : i32
    return %arg0, %c0_i32 : i32, i32
  }
  func.func @transform_4(%arg0: i32) -> (i32, i32) {
    %c0_i32 = arith.constant 0 : i32
    %c0_i32_0 = arith.constant 0 : i32
    return %arg0, %c0_i32 : i32, i32
  }
  func.func @transform_5(%arg0: i32) -> (i32, i32) {
    %c0_i32 = arith.constant 0 : i32
    %c0_i32_0 = arith.constant 0 : i32
    return %arg0, %c0_i32 : i32, i32
  }
}

module attributes {stable_mosaic.version = 11 : i64} {
  func.func @_conv1x1_bn_add_relu_kernel(%arg0: i32, %arg1: memref<8x648xbf16, #tpu.memory_space<vmem>>, %arg2: memref<32x8xbf16, #tpu.memory_space<vmem>>, %arg3: memref<1x648xf32, #tpu.memory_space<vmem>>, %arg4: memref<32x1xf32, #tpu.memory_space<vmem>>, %arg5: memref<32x1xf32, #tpu.memory_space<vmem>>, %arg6: memref<32x648xf32, #tpu.memory_space<vmem>>, %arg7: memref<32x648xf32, #tpu.memory_space<vmem>>) attributes {dimension_semantics = [#tpu.dimension_semantics<parallel>], iteration_bounds = array<i64: 1>, scalar_prefetch = 0 : i64, scratch_operands = 0 : i64, tpu.core_type = #tpu.core_type<tc>, window_params = [{pipeline_mode = #tpu.pipeline_mode<synchronous>, transform_indices = @transform_0, window_bounds = array<i64: 8, 648>}, {transform_indices = @transform_1, window_bounds = array<i64: 32, 8>}, {pipeline_mode = #tpu.pipeline_mode<synchronous>, transform_indices = @transform_2, window_bounds = array<i64: 1, 648>}, {transform_indices = @transform_3, window_bounds = array<i64: 32, 1>}, {transform_indices = @transform_4, window_bounds = array<i64: 32, 1>}, {transform_indices = @transform_5, window_bounds = array<i64: 32, 648>}, {transform_indices = @transform_6, window_bounds = array<i64: 32, 648>}]} {
    %c0 = arith.constant 0 : index
    %c0_0 = arith.constant 0 : index
    %0 = vector.load %arg2[%c0, %c0_0] : memref<32x8xbf16, #tpu.memory_space<vmem>>, vector<32x8xbf16>
    %c0_1 = arith.constant 0 : index
    %c0_2 = arith.constant 0 : index
    %1 = vector.load %arg1[%c0_1, %c0_2] : memref<8x648xbf16, #tpu.memory_space<vmem>>, vector<8x648xbf16>
    %cst = arith.constant dense<0.000000e+00> : vector<32x648xf32>
    %2 = tpu.matmul %0, %1, %cst {dimension_numbers = #tpu.dot_dimension_numbers<[1], [0], [0], [1], [0, 0, 1, 1], [], []>} : vector<32x8xbf16>, vector<8x648xbf16>, vector<32x648xf32> -> vector<32x648xf32>
    %c0_3 = arith.constant 0 : index
    %c0_4 = arith.constant 0 : index
    %3 = vector.load %arg3[%c0_3, %c0_4] : memref<1x648xf32, #tpu.memory_space<vmem>>, vector<1x648xf32>
    %c0_5 = arith.constant 0 : index
    %c0_6 = arith.constant 0 : index
    %4 = vector.load %arg4[%c0_5, %c0_6] : memref<32x1xf32, #tpu.memory_space<vmem>>, vector<32x1xf32>
    %c0_7 = arith.constant 0 : index
    %c0_8 = arith.constant 0 : index
    %5 = vector.load %arg5[%c0_7, %c0_8] : memref<32x1xf32, #tpu.memory_space<vmem>>, vector<32x1xf32>
    %6 = vector.broadcast %3 : vector<1x648xf32> to vector<32x648xf32>
    %7 = arith.mulf %2, %6 : vector<32x648xf32>
    %cst_9 = arith.constant dense<0.000000e+00> : vector<32xf32>
    %8 = vector.multi_reduction <add>, %7, %cst_9 [1] : vector<32x648xf32> to vector<32xf32>
    %9 = vector.shape_cast %8 : vector<32xf32> to vector<32x1xf32>
    %10 = arith.mulf %7, %2 : vector<32x648xf32>
    %cst_10 = arith.constant dense<0.000000e+00> : vector<32xf32>
    %11 = vector.multi_reduction <add>, %10, %cst_10 [1] : vector<32x648xf32> to vector<32xf32>
    %12 = vector.shape_cast %11 : vector<32xf32> to vector<32x1xf32>
    %cst_11 = arith.constant 0.001953125 : f32
    %13 = vector.broadcast %cst_11 : f32 to vector<32x1xf32>
    %14 = arith.mulf %9, %13 : vector<32x1xf32>
    %cst_12 = arith.constant 0.001953125 : f32
    %15 = vector.broadcast %cst_12 : f32 to vector<32x1xf32>
    %16 = arith.mulf %12, %15 : vector<32x1xf32>
    %17 = arith.mulf %14, %14 : vector<32x1xf32>
    %18 = arith.subf %16, %17 : vector<32x1xf32>
    %cst_13 = arith.constant 0.000000e+00 : f32
    %19 = vector.broadcast %cst_13 : f32 to vector<32x1xf32>
    %20 = arith.maximumf %18, %19 : vector<32x1xf32>
    %cst_14 = arith.constant 9.99999974E-6 : f32
    %21 = vector.broadcast %cst_14 : f32 to vector<32x1xf32>
    %22 = arith.addf %20, %21 : vector<32x1xf32>
    %23 = math.rsqrt %22 : vector<32x1xf32>
    %24 = arith.mulf %4, %23 : vector<32x1xf32>
    %25 = vector.broadcast %24 : vector<32x1xf32> to vector<32x648xf32>
    %26 = arith.mulf %2, %25 : vector<32x648xf32>
    %27 = arith.mulf %14, %24 : vector<32x1xf32>
    %28 = arith.subf %5, %27 : vector<32x1xf32>
    %29 = vector.broadcast %28 : vector<32x1xf32> to vector<32x648xf32>
    %30 = arith.addf %26, %29 : vector<32x648xf32>
    %c0_15 = arith.constant 0 : index
    %c0_16 = arith.constant 0 : index
    %31 = vector.load %arg6[%c0_15, %c0_16] : memref<32x648xf32, #tpu.memory_space<vmem>>, vector<32x648xf32>
    %32 = arith.addf %30, %31 : vector<32x648xf32>
    %cst_17 = arith.constant 0.000000e+00 : f32
    %33 = vector.broadcast %cst_17 : f32 to vector<32x648xf32>
    %34 = arith.maximumf %32, %33 : vector<32x648xf32>
    %c0_18 = arith.constant 0 : index
    %c0_19 = arith.constant 0 : index
    %35 = vector.load %arg7[%c0_18, %c0_19] : memref<32x648xf32, #tpu.memory_space<vmem>>, vector<32x648xf32>
    tpu.vector_store %arg7[%c0_18, %c0_19], %34 {strides = array<i32>} : memref<32x648xf32, #tpu.memory_space<vmem>>, vector<32x648xf32>,
    return
  }
  func.func @transform_0(%arg0: i32) -> (i32, i32) {
    %c0_i32 = arith.constant 0 : i32
    %c0_i32_0 = arith.constant 0 : i32
    %c0_i32_1 = arith.constant 0 : i32
    return %c0_i32, %c0_i32_0 : i32, i32
  }
  func.func @transform_1(%arg0: i32) -> (i32, i32) {
    %c0_i32 = arith.constant 0 : i32
    %c0_i32_0 = arith.constant 0 : i32
    return %arg0, %c0_i32 : i32, i32
  }
  func.func @transform_2(%arg0: i32) -> (i32, i32) {
    %c0_i32 = arith.constant 0 : i32
    %c0_i32_0 = arith.constant 0 : i32
    %c0_i32_1 = arith.constant 0 : i32
    return %c0_i32, %c0_i32_0 : i32, i32
  }
  func.func @transform_3(%arg0: i32) -> (i32, i32) {
    %c0_i32 = arith.constant 0 : i32
    %c0_i32_0 = arith.constant 0 : i32
    return %arg0, %c0_i32 : i32, i32
  }
  func.func @transform_4(%arg0: i32) -> (i32, i32) {
    %c0_i32 = arith.constant 0 : i32
    %c0_i32_0 = arith.constant 0 : i32
    return %arg0, %c0_i32 : i32, i32
  }
  func.func @transform_5(%arg0: i32) -> (i32, i32) {
    %c0_i32 = arith.constant 0 : i32
    %c0_i32_0 = arith.constant 0 : i32
    return %arg0, %c0_i32 : i32, i32
  }
  func.func @transform_6(%arg0: i32) -> (i32, i32) {
    %c0_i32 = arith.constant 0 : i32
    %c0_i32_0 = arith.constant 0 : i32
    return %arg0, %c0_i32 : i32, i32
  }
}

</mosaic_0001>

<bundles_post_ra>
// kernel: bottleneck_forward.4
= control target key start
LH: loop header
LB: loop body
LE: loop exit
PB: predicated region body
PF: predicated region fallthrough
CT: control target
= control target key end

     0   :  { %s669_s22 = smov 126   ;;  %s670_s23 = smov 127   ;;  %v676_v13 = vmov 0   ;;  %vm48_vm0 = vcmask 1039360   ;;  %vm72_vm1 = vcmask 1031168   ;;  %vm96_vm2 = vcmask 900096   ;;  %s934_s0 = inlined_call_operand.vmem [shape: bf16[1,8,686], index: 0, kind: input, shape index: {}]   ;;  %s935_s1 = inlined_call_operand.vmem [shape: bf16[8,72], index: 1, kind: input, shape index: {}]   ;;  %s936_s2 = inlined_call_operand.vmem [shape: f32[1,648], index: 2, kind: input, shape index: {}]   ;;  %s937_s3 = inlined_call_operand.vmem [shape: f32[8,1], index: 3, kind: input, shape index: {}]   ;;  %s938_s4 = inlined_call_operand.vmem [shape: f32[8,1], index: 4, kind: input, shape index: {}]   ;;  %s939_s5 = inlined_call_operand.vmem [shape: bf16[8,648], index: 5, kind: output, shape index: {}]  }
   0x1   :  { %v21_v0 = vld [vmem:[%s934_s0] sm:$0xff]  ;;  %v22_v1 = vld [vmem:[%s934_s0 + $0x8] sm:$0xff]  ;;  %s671_s24 = smov 110   ;;  %s672_s25 = smov 108   ;;  %v23_v8 = vld [vmem:[%s934_s0 + $0x10] sm:$0xff]  ;;  %314 = vmatprep.mubr.bf16.mxu0 %v676_v13  ;;  %355 = vmatprep.mubr.bf16.mxu1 %v676_v13  ;;  %vm120_vm3 = vcmask 891904  }
   0x2   :  { %v714_v2 = vunpack.c.h.bf16 %v21_v0  ;;  %v716_v3 = vunpack.c.l.bf16 %v22_v1  ;;  %v718_v4 = vunpack.c.h.bf16 %v22_v1  ;;  %v720_v5 = vunpack.c.l.bf16 %v21_v0  ;;  %s673_s26 = smov 109   ;;  %s674_s29 = smov 91   ;;  %665 = vset.pattern.permute.xlu0 %v676_v13  ;;  %666 = vset.pattern.permute.xlu1 %v676_v13 }
   0x3   :  { %s675_s30 = smov 92   ;;  %v737_v9 = vunpack.c.l.bf16 %v23_v8  ;;  %v739_v10 = vunpack.c.h.bf16 %v23_v8  ;;  %s677_s0 = smov 90   ;;  %vm144_vm4 = vcmask 883712   ;;  %vm192_vm5 = vcmask 744448  }
   0x4   :  { %v570_v6 = vpack.i.bf16 %v716_v3, %v714_v2  ;;  %v565_v7 = vpack.i.bf16 %v718_v4, %v720_v5  ;;  %v625_v11 = vpack.i.bf16 %v714_v2, %v720_v5  ;;  %vm168_vm6 = vcmask 752640  }
   0x5   :  { %v620_v12 = vpack.i.bf16 %v739_v10, %v737_v9  ;;  %v650_v14 = vpack.i.bf16 %v737_v9, %v718_v4  ;;  %vm216_vm7 = vcmask 736256   ;;  %vm263_vm8 = vcmask 1043456  }
   0x6   :  { %571 = vrot.lane.b32.xlu1 %v570_v6, %s669_s22  ;;  %561 = vrot.lane.b32.xlu0 %v570_v6, %s670_s23  ;;  %vm259_vm9 = vcmask 588800   ;;  %vm449_vm10 = vcmask 64512   ;;  %vm532_vm11 = vcmask 64516  }
   0x7   :  { %vm533_vm12 = vmor %vm532_vm11, %vm263_vm8 }
   0xa   :  { %576 = vrot.lane.b32.xlu1 %v570_v6, %s671_s24  ;;  %566 = vrot.lane.b32.xlu0 %v565_v7, %s670_s23 }
   0xe   :  { %586 = vrot.lane.b32.xlu1 %v565_v7, %s671_s24  ;;  %581 = vrot.lane.b32.xlu0 %v565_v7, %s669_s22 }
  0x12   :  { %596 = vrot.lane.b32.xlu1 %v570_v6, %s672_s25  ;;  %591 = vrot.lane.b32.xlu0 %v570_v6, %s673_s26 }
  0x16   :  { %606 = vrot.lane.b32.xlu1 %v565_v7, %s672_s25  ;;  %601 = vrot.lane.b32.xlu0 %v565_v7, %s673_s26 }
  0x1a   :  { %616 = vrot.lane.b32.xlu1 %v570_v6, %s674_s29  ;;  %611 = vrot.lane.b32.xlu0 %v570_v6, %s675_s30 }
  0x1e   :  { %180 = vrot.lane.b32.xlu1 %v720_v5, %s674_s29  ;;  %156 = vrot.lane.b32.xlu0 %v720_v5, %s675_s30 }
  0x22   :  { %626 = vrot.lane.b32.xlu1 %v625_v11, %s677_s0  ;;  %621 = vrot.lane.b32.xlu0 %v620_v12, %s670_s23 }
  0x26   :  { %631 = vrot.lane.b32.xlu1 %v620_v12, %s669_s22  ;;  %208 = vrot.lane.b32.xlu0 %v716_v3, %s677_s0 }
  0x2a   :  { %641 = vrot.lane.b32.xlu1 %v620_v12, %s673_s26  ;;  %636 = vrot.lane.b32.xlu0 %v620_v12, %s671_s24 }
  0x2e   :  { %651 = vrot.lane.b32.xlu1 %v650_v14, %s675_s30  ;;  %646 = vrot.lane.b32.xlu0 %v620_v12, %s672_s25 }
  0x32   :  { %661 = vrot.lane.b32.xlu1 %v650_v14, %s677_s0  ;;  %656 = vrot.lane.b32.xlu0 %v650_v14, %s674_s29 }
  0x36   :  { %190 = vrot.lane.b32.xlu1 %v739_v10, %s674_s29  ;;  %166 = vrot.lane.b32.xlu0 %v739_v10, %s675_s30 }
  0x3a   :  { %214 = vrot.lane.b32.xlu0 %v739_v10, %s677_s0 }
  0x78   :  { %v761_v15 = vpop.permute.xlu1 %571  ;;  %v763_v16 = vpop.permute.xlu0 %561 }
  0x79   :  { %v574_v17 = vunpack.i.h.bf16 %v761_v15  ;;  %v573_v18 = vunpack.i.l.bf16 %v761_v15  ;;  %v564_v19 = vunpack.i.h.bf16 %v763_v16  ;;  %v563_v20 = vunpack.i.l.bf16 %v763_v16 }
  0x7b   :  { %v50_v21 = vsel %vm48_vm0, %v563_v20, %v564_v19  ;;  %v74_v28 = vsel %vm72_vm1, %v573_v18, %v574_v17 }
  0x7c   :  { %v772_v22 = vpop.permute.xlu1 %576  ;;  %v774_v23 = vpop.permute.xlu0 %566  ;;  %v229_v24 = vpack.c.bf16 %v50_v21, %v714_v2 }
  0x7d   :  { %v579_v25 = vunpack.i.h.bf16 %v772_v22  ;;  %v578_v26 = vunpack.i.l.bf16 %v772_v22  ;;  %v568_v27 = vunpack.i.l.bf16 %v774_v23  ;;  %v569_v7 = vunpack.i.h.bf16 %v774_v23 }
  0x7e   :  { %282 = vmatprep.subr.bf16.mxu0 %v229_v24 }
  0x7f   :  { %v49_v29 = vsel %vm48_vm0, %v568_v27, %v563_v20  ;;  %v98_v30 = vsel %vm96_vm2, %v578_v26, %v579_v25  ;;  %v51_v21 = vsel %vm48_vm0, %v564_v19, %v569_v7 }
  0x80   :  { %v787_v31 = vpop.permute.xlu1 %586  ;;  %v789_v32 = vpop.permute.xlu0 %581  ;;  %v228_v33 = vpack.c.bf16 %v49_v29, %v720_v5  ;;  %v235_v34 = vpack.c.bf16 %v98_v30, %v74_v28  ;;  %v230_v19 = vpack.c.bf16 %v51_v21, %v716_v3 }
  0x81   :  { %v588_v35 = vunpack.i.l.bf16 %v787_v31  ;;  %v583_v36 = vunpack.i.l.bf16 %v789_v32  ;;  %v584_v23 = vunpack.i.h.bf16 %v789_v32 }
  0x82   :  { %283 = vmatpush1.bf16.msra.mxu0 %v228_v33 }
  0x83   :  { %284 = vmatprep.subr.bf16.mxu0 %v235_v34  ;;  %v73_v37 = vsel %vm72_vm1, %v583_v36, %v573_v18  ;;  %v97_v38 = vsel %vm96_vm2, %v588_v35, %v578_v26  ;;  %v589_v34 = vunpack.i.h.bf16 %v787_v31  ;;  %v75_v3 = vsel %vm72_vm1, %v574_v17, %v584_v23 }
  0x84   :  { %v796_v39 = vpop.permute.xlu1 %596  ;;  %v798_v40 = vpop.permute.xlu0 %591  ;;  %v234_v41 = vpack.c.bf16 %v97_v38, %v73_v37 }
  0x85   :  { %v599_v42 = vunpack.i.h.bf16 %v796_v39  ;;  %v598_v43 = vunpack.i.l.bf16 %v796_v39  ;;  %v594_v44 = vunpack.i.h.bf16 %v798_v40  ;;  %v593_v45 = vunpack.i.l.bf16 %v798_v40 }
  0x86   :  { %285 = vmatpush1.bf16.msra.mxu0 %v234_v41 }
  0x87   :  { %v122_v46 = vsel %vm120_vm3, %v593_v45, %v594_v44  ;;  %v146_v47 = vsel %vm144_vm4, %v598_v43, %v599_v42 }
  0x88   :  { %v810_v48 = vpop.permute.xlu1 %606  ;;  %v812_v49 = vpop.permute.xlu0 %601  ;;  %v241_v50 = vpack.c.bf16 %v146_v47, %v122_v46 }
  0x89   :  { %v608_v51 = vunpack.i.l.bf16 %v810_v48  ;;  %v603_v52 = vunpack.i.l.bf16 %v812_v49  ;;  %v604_v41 = vunpack.i.h.bf16 %v812_v49  ;;  %v860_v49 = vld [vmem:[%s935_s1] sm:$0xf] }
  0x8a   :  { %286 = vmatprep.subr.bf16.mxu0 %v241_v50 }
  0x8b   :  { %v121_v53 = vsel %vm120_vm3, %v603_v52, %v593_v45  ;;  %v145_v54 = vsel %vm144_vm4, %v608_v51, %v598_v43  ;;  %v609_v45 = vunpack.i.h.bf16 %v810_v48 }
  0x8c   :  { %v818_v55 = vpop.permute.xlu1 %616  ;;  %v820_v56 = vpop.permute.xlu0 %611  ;;  %v240_v57 = vpack.c.bf16 %v145_v54, %v121_v53 }
  0x8d   :  { %v619_v58 = vunpack.i.h.bf16 %v818_v55  ;;  %v618_v59 = vunpack.i.l.bf16 %v818_v55  ;;  %v614_v60 = vunpack.i.h.bf16 %v820_v56  ;;  %v613_v61 = vunpack.i.l.bf16 %v820_v56 }
  0x8e   :  { %287 = vmatpush1.bf16.msra.mxu0 %v240_v57 }
  0x8f   :  { %v170_v62 = vsel %vm168_vm6, %v613_v61, %v614_v60  ;;  %v194_v63 = vsel %vm192_vm5, %v618_v59, %v619_v58 }
  0x90   :  { %v181_v0 = vpop.permute.xlu1 %180  ;;  %v157_v1 = vpop.permute.xlu0 %156  ;;  %v247_v2 = vpack.c.bf16 %v194_v63, %v170_v62 }
  0x91   :  { %v193_v5 = vsel %vm192_vm5, %v181_v0, %v618_v59  ;;  %v169_v6 = vsel %vm168_vm6, %v157_v1, %v613_v61  ;;  %v147_v0 = vsel %vm144_vm4, %v599_v42, %v609_v45 }
  0x92   :  { %v246_v8 = vpack.c.bf16 %v193_v5, %v169_v6  ;;  %288 = vmatprep.subr.bf16.mxu0 %v247_v2 }
  0x94   :  { %v627_v11 = vpop.permute.xlu1 %626  ;;  %v622_v12 = vpop.permute.xlu0 %621  ;;  %289 = vmatpush1.bf16.msra.mxu0 %v246_v8 }
  0x95   :  { %v629_v14 = vunpack.i.h.bf16 %v627_v11  ;;  %v628_v18 = vunpack.i.l.bf16 %v627_v11  ;;  %v623_v20 = vunpack.i.l.bf16 %v622_v12  ;;  %v624_v24 = vunpack.i.h.bf16 %v622_v12 }
  0x97   :  { %v52_v26 = vsel %vm48_vm0, %v569_v7, %v623_v20  ;;  %v217_v27 = vsel %vm216_vm7, %v628_v18, %v629_v14  ;;  %v53_v32 = vsel %vm48_vm0, %v623_v20, %v624_v24 }
  0x98   :  { %v632_v28 = vpop.permute.xlu1 %631  ;;  %v841_v29 = vpop.permute.xlu0 %208  ;;  %v231_v30 = vpack.c.bf16 %v52_v26, %v718_v4  ;;  %v252_v33 = vpack.c.bf16 %v217_v27, %v217_v27  ;;  %v233_v4 = vpack.c.bf16 %v624_v24, %v739_v10  ;;  %v99_v10 = vsel %vm96_vm2, %v579_v25, %v589_v34 }
  0x99   :  { %v218_v16 = vsel %vm216_vm7, %v629_v14, %v841_v29  ;;  %v634_v35 = vunpack.i.h.bf16 %v632_v28  ;;  %v633_v36 = vunpack.i.l.bf16 %v632_v28  ;;  %v232_v50 = vpack.c.bf16 %v53_v32, %v737_v9 }
  0x9a   :  { %v253_v37 = vpack.c.bf16 %v218_v16, %v218_v16  ;;  %323 = vmatprep.subr.bf16.mxu1 %v231_v30  ;;  %v265_v38 = vsel %vm263_vm8, %v252_v33, 0  ;;  %v236_v25 = vpack.c.bf16 %v99_v10, %v75_v3  ;;  %v123_v9 = vsel %vm120_vm3, %v594_v44, %v604_v41  ;;  %v405_v3 = vld [vmem:[%s936_s2] sm:$0x3f] }
  0x9b   :  { %324 = vmatpush1.bf16.msra.mxu1 %v230_v19  ;;  %v77_v15 = vsel %vm72_vm1, %v633_v36, %v634_v35  ;;  %v76_v17 = vsel %vm72_vm1, %v584_v23, %v633_v36  ;;  %v242_v42 = vpack.c.bf16 %v147_v0, %v123_v9 }
  0x9c   :  { %v642_v43 = vpop.permute.xlu1 %641  ;;  %v637_v31 = vpop.permute.xlu0 %636  ;;  %539 = vmatprep.subr.msk.bf16.mxu0 %vm263_vm8, %v253_v37 }
  0x9d   :  { %v639_v46 = vunpack.i.h.bf16 %v637_v31  ;;  %v638_v47 = vunpack.i.l.bf16 %v637_v31  ;;  %291 = vmatpush1.bf16.msra.mxu0 %v265_v38  ;;  %v644_v51 = vunpack.i.h.bf16 %v642_v43  ;;  %v643_v48 = vunpack.i.l.bf16 %v642_v43 }
  0x9e   :  { %364 = vmatprep.subr.bf16.mxu0 %v233_v4  ;;  %v409_v4 = vlaneseq }
  0x9f   :  { %v239_v52 = vpack.c.bf16 %v639_v46, %v634_v35  ;;  %v101_v53 = vsel %vm96_vm2, %v638_v47, %v639_v46  ;;  %v100_v54 = vsel %vm96_vm2, %v589_v34, %v638_v47  ;;  %v125_v1 = vsel %vm120_vm3, %v643_v48, %v644_v51 }
  0xa0   :  { %v652_v57 = vpop.permute.xlu1 %651  ;;  %v647_v59 = vpop.permute.xlu0 %646  ;;  %540 = vmatmul.mubr.msk.bf16.vlgmr.msra.gmra.mrb[0].mxu0 %vm259_vm9, %v860_v49  ;;  %v237_v22 = vpack.c.bf16 %v100_v54, %v76_v17  ;;  %v238_v2 = vpack.c.bf16 %v101_v53, %v77_v15  ;;  %v124_v44 = vsel %vm120_vm3, %v604_v41, %v643_v48  ;;  %v410_v43 = vshrl.u32 %v409_v4, 7 }
  0xa1   :  { %v654_v61 = vunpack.i.h.bf16 %v652_v57  ;;  %v649_v62 = vunpack.i.h.bf16 %v647_v59  ;;  %v648_v63 = vunpack.i.l.bf16 %v647_v59  ;;  %365 = vmatpush1.bf16.msra.mxu0 %v232_v50  ;;  %396 = vmatprep.mubr.bf16.mxu0 %v676_v13  ;;  %v653_v5 = vunpack.i.l.bf16 %v652_v57 }
  0xa2   :  { %325 = vmatprep.subr.bf16.mxu1 %v237_v22  ;;  %366 = vmatprep.subr.bf16.mxu0 %v239_v52  ;;  %v411_v31 = vsub.s32 0, %v410_v43  ;;  %v419_v57 = vsub.s32 2, %v410_v43  ;;  %v423_v59 = vsub.s32 3, %v410_v43  ;;  %v427_v22 = vsub.s32 4, %v410_v43 }
  0xa3   :  { %v245_v6 = vpack.c.bf16 %v649_v62, %v644_v51  ;;  %v149_v40 = vsel %vm144_vm4, %v648_v63, %v649_v62  ;;  %326 = vmatpush1.bf16.msra.mxu1 %v236_v25  ;;  %v148_v7 = vsel %vm144_vm4, %v609_v45, %v648_v63  ;;  %v172_v13 = vsel %vm168_vm6, %v653_v5, %v654_v61 }
  0xa4   :  { %v662_v8 = vpop.permute.xlu1 %661  ;;  %v657_v39 = vpop.permute.xlu0 %656  ;;  %v243_v11 = vpack.c.bf16 %v148_v7, %v124_v44  ;;  %v244_v21 = vpack.c.bf16 %v149_v40, %v125_v1  ;;  %v171_v24 = vsel %vm168_vm6, %v614_v60, %v653_v5  ;;  %v415_v45 = vsub.s32 1, %v410_v43 }
  0xa5   :  { %v664_v12 = vunpack.i.h.bf16 %v662_v8  ;;  %v663_v14 = vunpack.i.l.bf16 %v662_v8  ;;  %v659_v18 = vunpack.i.h.bf16 %v657_v39  ;;  %v658_v20 = vunpack.i.l.bf16 %v657_v39  ;;  %367 = vmatpush1.bf16.msra.mxu0 %v238_v2 }
  0xa6   :  { %327 = vmatprep.subr.bf16.mxu1 %v243_v11  ;;  %368 = vmatprep.subr.bf16.mxu0 %v245_v6  ;;  %v412_v46 = vrot.slane %v405_v3, %v411_v31  ;;  %v416_v47 = vrot.slane %v405_v3, %v415_v45  ;;  %v431_v25 = vsub.s32 5, %v410_v43  ;;  %v420_v9 = vrot.slane %v405_v3, %v419_v57 }
  0xa7   :  { %v220_v26 = vsel %vm216_vm7, %v663_v14, %v664_v12  ;;  %328 = vmatpush1.bf16.msra.mxu1 %v242_v42  ;;  %v196_v27 = vsel %vm192_vm5, %v658_v20, %v659_v18  ;;  %v195_v23 = vsel %vm192_vm5, %v619_v58, %v658_v20  ;;  %v219_v28 = vsel %vm216_vm7, %v841_v29, %v663_v14 }
  0xa8   :  { %v255_v30 = vpack.c.bf16 %v220_v26, %v220_v26  ;;  %v191_v33 = vpop.permute.xlu1 %190  ;;  %v167_v34 = vpop.permute.xlu0 %166  ;;  %v249_v16 = vpack.c.bf16 %v196_v27, %v172_v13  ;;  %v248_v19 = vpack.c.bf16 %v195_v23, %v171_v24  ;;  %v254_v37 = vpack.c.bf16 %v219_v28, %v219_v28 }
  0xa9   :  { %v197_v56 = vsel %vm192_vm5, %v659_v18, %v191_v33  ;;  %v173_v60 = vsel %vm168_vm6, %v654_v61, %v167_v34  ;;  %v251_v35 = vpack.c.bf16 %v191_v33, %v167_v34  ;;  %369 = vmatpush1.bf16.msra.mxu0 %v244_v21  ;;  %v424_v61 = vrot.slane %v405_v3, %v423_v59 }
  0xaa   :  { %v250_v36 = vpack.c.bf16 %v197_v56, %v173_v60  ;;  %329 = vmatprep.subr.bf16.mxu1 %v249_v16  ;;  %v271_v32 = vsel %vm263_vm8, %v254_v37, 0  ;;  %v428_v62 = vrot.slane %v405_v3, %v427_v22  ;;  %v432_v0 = vrot.slane %v405_v3, %v431_v25 }
  0xab   :  { %330 = vmatpush1.bf16.msra.mxu1 %v248_v19  ;;  %370 = vmatprep.subr.bf16.mxu0 %v251_v35 }
  0xac   :  { %v215_v55 = vpop.permute.xlu0 %214  ;;  %541 = vmatprep.subr.msk.bf16.mxu1 %vm263_vm8, %v255_v30 }
  0xad   :  { %v221_v58 = vsel %vm216_vm7, %v664_v12, %v215_v55  ;;  %v257_v29 = vpack.c.bf16 %v215_v55, %v215_v55  ;;  %371 = vmatpush1.bf16.msra.mxu0 %v250_v36 }
  0xae   :  { %v256_v38 = vpack.c.bf16 %v221_v58, %v221_v58  ;;  %v406_v58 = vld [vmem:[%s937_s3] sm:$0xff] }
  0xaf   :  { %332 = vmatpush1.bf16.msra.mxu1 %v271_v32  ;;  %543 = vmatprep.subr.msk.bf16.mxu0 %vm263_vm8, %v257_v29  ;;  %v407_v32 = vld [vmem:[%s938_s4] sm:$0xff] }
  0xb0   :  { %v277_v41 = vsel %vm263_vm8, %v256_v38, 0 }
  0xb1   :  { %373 = vmatpush1.bf16.msra.mxu0 %v277_v41 }
  0xb2   :  { %542 = vmatmul.mubr.msk.bf16.vlgmr.msra.gmra.mrb[0].mxu1 %vm259_vm9, %v860_v49 }
  0xb4   :  { %544 = vmatmul.mubr.msk.bf16.vlgmr.msra.gmra.mrb[4].mxu0 %vm259_vm9, %v860_v49 }
 0x173   :  { %v908_v10 = vpop.f32.mrb[0].mxu0 }
 0x174   :  { %v439_v50 = vmul.f32 %v412_v46, %v908_v10  ;;  %v911_v15 = vpop.f32.mrb[1].mxu0 }
 0x175   :  { %v440_v51 = vmul.f32 %v416_v47, %v911_v15  ;;  %v320_v17 = vpop.f32.mrb[2].mxu0 }
 0x176   :  { %v454_v49 = vmul.f32 %v439_v50, %v908_v10  ;;  %v321_v48 = vpop.f32.mrb[3].mxu0 }
 0x177   :  { %v445_v52 = vadd.f32 %v440_v51, %v439_v50  ;;  %v455_v53 = vmul.f32 %v440_v51, %v911_v15 }
 0x179   :  { %v460_v54 = vadd.f32 %v455_v53, %v454_v49 }
 0x185   :  { %v357_v63 = vpop.f32.mrb[0].mxu1 }
 0x186   :  { %v441_v1 = vmul.f32 %v420_v9, %v357_v63  ;;  %v359_v2 = vpop.f32.mrb[1].mxu1 }
 0x187   :  { %v442_v5 = vmul.f32 %v424_v61, %v359_v2  ;;  %v361_v6 = vpop.f32.mrb[2].mxu1  ;;  %v398_v40 = vpop.f32.mrb[4].mxu0 }
 0x188   :  { %v446_v44 = vadd.f32 %v445_v52, %v441_v1  ;;  %v456_v7 = vmul.f32 %v441_v1, %v357_v63  ;;  %v443_v8 = vmul.f32 %v428_v62, %v398_v40  ;;  %v362_v39 = vpop.f32.mrb[3].mxu1  ;;  %v400_v11 = vpop.f32.mrb[5].mxu0 }
 0x189   :  { %v457_v42 = vmul.f32 %v442_v5, %v359_v2  ;;  %v444_v13 = vmul.f32 %v432_v0, %v400_v11  ;;  %v402_v12 = vpop.f32.mrb[6].mxu0 }
 0x18a   :  { %v461_v14 = vadd.f32 %v460_v54, %v456_v7  ;;  %v403_v18 = vpop.f32.mrb[7].mxu0  ;;  %v447_v20 = vadd.f32 %v446_v44, %v442_v5  ;;  %v458_v26 = vmul.f32 %v443_v8, %v398_v40 }
 0x18b   :  { %v459_v21 = vmul.f32 %v444_v13, %v400_v11  ;;  %v450_v24 = vsel %vm449_vm10, %v444_v13, 0.0 }
 0x18c   :  { %v448_v27 = vadd.f32 %v447_v20, %v443_v8  ;;  %v462_v23 = vadd.f32 %v461_v14, %v457_v42 }
 0x18d   :  { %v464_v33 = vsel %vm449_vm10, %v459_v21, 0.0 }
 0x18e   :  { %v451_v28 = vadd.f32 %v450_v24, %v448_v27  ;;  %v463_v30 = vadd.f32 %v462_v23, %v458_v26 }
 0x190   :  { %452 = vadd.xlane.f32.xlu1 %v451_v28  ;;  %v465_v34 = vadd.f32 %v464_v33, %v463_v30 }
 0x192   :  { %466 = vadd.xlane.f32.xlu0 %v465_v34 }
 0x21d   :  { %v453_v16 = vpop.xlane.xlu1 %452 }
 0x21e   :  { %v468_v19 = vmul.f32 0.001953125, %v453_v16 }
 0x21f   :  { %v467_v56 = vpop.xlane.xlu0 %466 }
 0x220   :  { %v470_v60 = vmul.f32 %v468_v19, %v468_v19  ;;  %v469_v35 = vmul.f32 0.001953125, %v467_v56 }
 0x222   :  { %v471_v36 = vsub.f32 %v469_v35, %v470_v60 }
 0x224   :  { %v472_v37 = vmax.f32 %v471_v36, 0.0 }
 0x226   :  { %v473_v55 = vadd.f32 1e-05, %v472_v37 }
 0x228   :  { %667 = vrsqrt.f32 %v473_v55 }
 0x232   :  { %v668_v29 = vpop.eup %667 }
 0x233   :  { %v475_v38 = vmul.f32 %v668_v29, %v406_v58 }
 0x235   :  { %478 = vperm.xlu0 %665, %v475_v38   ;;  %v487_v41 = vmul.f32 %v475_v38, %v468_v19 }
 0x237   :  { %v488_v4 = vsub.f32 %v407_v32, %v487_v41 }
 0x239   :  { %491 = vperm.xlu1 %666, %v488_v4  }
 0x2b4   :  { %v479_v43 = vpop.permute.xlu0 %478 }
 0x2b5   :  { %v481_v31 = vmul.f32 %v479_v43, %v908_v10  ;;  %v482_v3 = vmul.f32 %v479_v43, %v911_v15  ;;  %v483_v45 = vmul.f32 %v479_v43, %v357_v63  ;;  %v484_v46 = vmul.f32 %v479_v43, %v359_v2 }
 0x2b6   :  { %v485_v47 = vmul.f32 %v479_v43, %v398_v40  ;;  %v486_v50 = vmul.f32 %v479_v43, %v400_v11 }
 0x2b8   :  { %v492_v51 = vpop.permute.xlu1 %491 }
 0x2b9   :  { %v494_v17 = vadd.f32 %v492_v51, %v481_v31  ;;  %v495_v49 = vadd.f32 %v492_v51, %v482_v3  ;;  %v496_v48 = vadd.f32 %v492_v51, %v483_v45  ;;  %v497_v52 = vadd.f32 %v492_v51, %v484_v46 }
 0x2ba   :  { %v498_v53 = vadd.f32 %v492_v51, %v485_v47  ;;  %v499_v54 = vadd.f32 %v492_v51, %v486_v50 }
 0x2bb   :  { %v500_v57 = vmax.f32 %v494_v17, 0.0  ;;  %v501_v59 = vmax.f32 %v495_v49, 0.0  ;;  %v502_v22 = vmax.f32 %v496_v48, 0.0  ;;  %v503_v25 = vmax.f32 %v497_v52, 0.0 }
 0x2bc   :  { %v504_v9 = vmax.f32 %v498_v53, 0.0  ;;  %v505_v10 = vmax.f32 %v499_v54, 0.0 }
 0x2bd   :  { %v548_v15 = vpack.c.bf16 %v501_v59, %v500_v57  ;;  %v549_v61 = vpack.c.bf16 %v503_v25, %v502_v22 }
 0x2be   :  { %v550_v62 = vpack.c.bf16 %v505_v10, %v504_v9 }
 0x2bf   :  { %530 = vst [vmem:[%s939_s5] sm:$0xff] %v548_v15  ;;  %531 = vst [vmem:[%s939_s5 + $0x8] sm:$0xff] %v549_v61 }
 0x2c0   :  { %534 = vst.msk [vmem:[%s939_s5 + $0x10] sm:$0xff] %vm533_vm12, %v550_v62 }

// kernel: bottleneck_forward.3
= control target key start
LH: loop header
LB: loop body
LE: loop exit
PB: predicated region body
PF: predicated region fallthrough
CT: control target
= control target key end

     0   :  { %v406_v1 = vmov 0   ;;  %vm94_vm0 = vcmask 261120   ;;  %v225_v14 = vlaneseq  ;;  %vm265_vm1 = vcmask 375808   ;;  %s523_s0 = inlined_call_operand.vmem [shape: bf16[32,686], index: 0, kind: input, shape index: {}]   ;;  %s524_s1 = inlined_call_operand.vmem [shape: bf16[8,32], index: 1, kind: input, shape index: {}]   ;;  %s525_s2 = inlined_call_operand.vmem [shape: f32[1,686], index: 2, kind: input, shape index: {}]   ;;  %s526_s3 = inlined_call_operand.vmem [shape: f32[8,1], index: 3, kind: input, shape index: {}]   ;;  %s527_s4 = inlined_call_operand.vmem [shape: f32[8,1], index: 4, kind: input, shape index: {}]   ;;  %s528_s5 = inlined_call_operand.vmem [shape: bf16[8,686], index: 5, kind: output, shape index: {}]  }
   0x1   :  { %v386_v0 = vld [vmem:[%s523_s0 + $0x4] ss:$24 sps:$4 sm:$0xff]   ;;  %130 = vmatprep.mubr.bf16.mxu0 %v406_v1  ;;  %171 = vmatprep.mubr.bf16.mxu1 %v406_v1  ;;  %v388_v2 = vld [vmem:[%s523_s0] ss:$24 sps:$4 sm:$0xff]   ;;  %v392_v5 = vld [vmem:[%s523_s0 + $0x34] ss:$24 sps:$4 sm:$0xff]  }
   0x2   :  { %384 = vset.pattern.permute.xlu1 %v406_v1  ;;  %385 = vset.pattern.permute.xlu0 %v406_v1  ;;  %v389_v3 = vld [vmem:[%s523_s0 + $0xc] ss:$24 sps:$4 sm:$0xff]   ;;  %v391_v4 = vld [vmem:[%s523_s0 + $0x8] ss:$24 sps:$4 sm:$0xff]   ;;  %v395_v7 = vld [vmem:[%s523_s0 + $0x3c] ss:$24 sps:$4 sm:$0xff]  }
   0x3   :  { %98 = vmatprep.subr.bf16.mxu0 %v386_v0  ;;  %v394_v6 = vld [vmem:[%s523_s0 + $0x30] ss:$24 sps:$4 sm:$0xff]   ;;  %139 = vmatprep.subr.bf16.mxu1 %v389_v3  ;;  %v21_v9 = vld [vmem:[%s524_s1] sm:$0xf]  ;;  %v400_v10 = vld [vmem:[%s523_s0 + $0x14] ss:$24 sps:$4 sm:$0xff]  }
   0x4   :  { %99 = vmatpush1.bf16.msra.mxu0 %v388_v2  ;;  %140 = vmatpush1.bf16.msra.mxu1 %v391_v4  ;;  %v397_v8 = vld [vmem:[%s523_s0 + $0x38] ss:$24 sps:$4 sm:$0xff]   ;;  %v403_v12 = vld [vmem:[%s523_s0 + $0x44] ss:$24 sps:$4 sm:$0xff]   ;;  %v226_v15 = vshrl.u32 %v225_v14, 7  ;;  %vm354_vm2 = vcmask 1043456  }
   0x5   :  { %100 = vmatprep.subr.bf16.mxu0 %v392_v5  ;;  %141 = vmatprep.subr.bf16.mxu1 %v395_v7  ;;  %v398_v11 = vld [vmem:[%s523_s0 + $0x10] ss:$24 sps:$4 sm:$0xff]   ;;  %v401_v13 = vld [vmem:[%s523_s0 + $0x40] ss:$24 sps:$4 sm:$0xff]   ;;  %vm355_vm3 = vcmask 375812  }
   0x6   :  { %v227_v16 = vsub.s32 0, %v226_v15  ;;  %v221_v17 = vld [vmem:[%s525_s2] sm:$0x3f]  ;;  %v231_v18 = vsub.s32 1, %v226_v15  ;;  %v235_v19 = vsub.s32 2, %v226_v15  ;;  %v239_v20 = vsub.s32 3, %v226_v15  ;;  %vm356_vm4 = vmor %vm355_vm3, %vm354_vm2 }
   0x7   :  { %v243_v28 = vsub.s32 4, %v226_v15  ;;  %v247_v32 = vsub.s32 5, %v226_v15 }
   0x8   :  { %101 = vmatpush1.bf16.msra.mxu0 %v394_v6  ;;  %142 = vmatpush1.bf16.msra.mxu1 %v397_v8  ;;  %v479_v21 = vrot.slane %v221_v17, %v227_v16  ;;  %v481_v22 = vrot.slane %v221_v17, %v231_v18  ;;  %v483_v23 = vrot.slane %v221_v17, %v235_v19 }
   0x9   :  { %180 = vmatprep.subr.bf16.mxu0 %v400_v10  ;;  %v487_v25 = vrot.slane %v221_v17, %v239_v20  ;;  %v495_v43 = vrot.slane %v221_v17, %v243_v28  ;;  %v497_v46 = vrot.slane %v221_v17, %v247_v32 }
   0xb   :  { %374 = vmatmul.mubr.msk.bf16.vlgmr.msra.gmra.mrb[0].mxu0 %vm94_vm0, %v21_v9  ;;  %375 = vmatmul.mubr.msk.bf16.vlgmr.msra.gmra.mrb[0].mxu1 %vm94_vm0, %v21_v9 }
   0xc   :  { %181 = vmatpush1.bf16.msra.mxu0 %v398_v11  ;;  %212 = vmatprep.mubr.bf16.mxu0 %v406_v1 }
   0xd   :  { %182 = vmatprep.subr.bf16.mxu0 %v403_v12  ;;  %v223_v12 = vld [vmem:[%s527_s4] sm:$0xff] }
  0x10   :  { %183 = vmatpush1.bf16.msra.mxu0 %v401_v13 }
  0x13   :  { %376 = vmatmul.mubr.msk.bf16.vlgmr.msra.gmra.mrb[4].mxu0 %vm94_vm0, %v21_v9  ;;  %v222_v9 = vld [vmem:[%s526_s3] sm:$0xff] }
  0xde   :  { %v485_v24 = vpop.f32.mrb[0].mxu0  ;;  %v173_v31 = vpop.f32.mrb[0].mxu1 }
  0xdf   :  { %v255_v26 = vmul.f32 %v479_v21, %v485_v24  ;;  %v134_v27 = vpop.f32.mrb[1].mxu0  ;;  %v257_v34 = vmul.f32 %v483_v23, %v173_v31  ;;  %v175_v36 = vpop.f32.mrb[1].mxu1 }
  0xe0   :  { %v256_v29 = vmul.f32 %v481_v22, %v134_v27  ;;  %v136_v30 = vpop.f32.mrb[2].mxu0  ;;  %v258_v39 = vmul.f32 %v487_v25, %v175_v36  ;;  %v177_v40 = vpop.f32.mrb[2].mxu1 }
  0xe1   :  { %v270_v33 = vmul.f32 %v255_v26, %v485_v24  ;;  %v137_v35 = vpop.f32.mrb[3].mxu0  ;;  %v272_v41 = vmul.f32 %v257_v34, %v173_v31  ;;  %v178_v42 = vpop.f32.mrb[3].mxu1 }
  0xe2   :  { %v261_v37 = vadd.f32 %v256_v29, %v255_v26  ;;  %v271_v38 = vmul.f32 %v256_v29, %v134_v27  ;;  %v273_v48 = vmul.f32 %v258_v39, %v175_v36 }
  0xe4   :  { %v276_v44 = vadd.f32 %v271_v38, %v270_v33  ;;  %v262_v45 = vadd.f32 %v261_v37, %v257_v34 }
  0xe6   :  { %v277_v47 = vadd.f32 %v276_v44, %v272_v41  ;;  %v214_v49 = vpop.f32.mrb[4].mxu0  ;;  %v263_v50 = vadd.f32 %v262_v45, %v258_v39 }
  0xe7   :  { %v259_v51 = vmul.f32 %v495_v43, %v214_v49  ;;  %v216_v52 = vpop.f32.mrb[5].mxu0 }
  0xe8   :  { %v218_v53 = vpop.f32.mrb[6].mxu0  ;;  %v260_v54 = vmul.f32 %v497_v46, %v216_v52  ;;  %v278_v55 = vadd.f32 %v277_v47, %v273_v48 }
  0xe9   :  { %v274_v56 = vmul.f32 %v259_v51, %v214_v49  ;;  %v219_v57 = vpop.f32.mrb[7].mxu0  ;;  %v264_v58 = vadd.f32 %v263_v50, %v259_v51 }
  0xea   :  { %v266_v59 = vsel %vm265_vm1, %v260_v54, 0.0  ;;  %v275_v60 = vmul.f32 %v260_v54, %v216_v52 }
  0xeb   :  { %v267_v61 = vadd.f32 %v266_v59, %v264_v58  ;;  %v279_v62 = vadd.f32 %v278_v55, %v274_v56 }
  0xec   :  { %v280_v63 = vsel %vm265_vm1, %v275_v60, 0.0 }
  0xed   :  { %268 = vadd.xlane.f32.xlu0 %v267_v61  ;;  %v281_v0 = vadd.f32 %v280_v63, %v279_v62 }
  0xf1   :  { %282 = vadd.xlane.f32.xlu0 %v281_v0 }
 0x17a   :  { %v269_v1 = vpop.xlane.xlu0 %268 }
 0x17b   :  { %v284_v2 = vmul.f32 0.001953125, %v269_v1 }
 0x17d   :  { %v286_v4 = vmul.f32 %v284_v2, %v284_v2 }
 0x17e   :  { %v283_v3 = vpop.xlane.xlu0 %282 }
 0x17f   :  { %v285_v5 = vmul.f32 0.001953125, %v283_v3 }
 0x181   :  { %v287_v6 = vsub.f32 %v285_v5, %v286_v4 }
 0x183   :  { %v288_v7 = vmax.f32 %v287_v6, 0.0 }
 0x185   :  { %v289_v8 = vadd.f32 1e-05, %v288_v7 }
 0x187   :  { %404 = vrsqrt.f32 %v289_v8 }
 0x191   :  { %v405_v10 = vpop.eup %404 }
 0x192   :  { %v291_v11 = vmul.f32 %v405_v10, %v222_v9 }
 0x194   :  { %294 = vperm.xlu1 %384, %v291_v11   ;;  %v303_v13 = vmul.f32 %v291_v11, %v284_v2 }
 0x196   :  { %v304_v14 = vsub.f32 %v223_v12, %v303_v13 }
 0x198   :  { %307 = vperm.xlu1 %384, %v304_v14  }
 0x213   :  { %v295_v15 = vpop.permute.xlu1 %294 }
 0x214   :  { %v297_v16 = vmul.f32 %v295_v15, %v485_v24  ;;  %v298_v17 = vmul.f32 %v295_v15, %v134_v27  ;;  %v299_v18 = vmul.f32 %v295_v15, %v173_v31  ;;  %v300_v19 = vmul.f32 %v295_v15, %v175_v36 }
 0x215   :  { %v301_v20 = vmul.f32 %v295_v15, %v214_v49  ;;  %v302_v26 = vmul.f32 %v295_v15, %v216_v52 }
 0x217   :  { %v308_v28 = vpop.permute.xlu1 %307 }
 0x218   :  { %v310_v29 = vadd.f32 %v308_v28, %v297_v16  ;;  %v311_v30 = vadd.f32 %v308_v28, %v298_v17  ;;  %v312_v32 = vadd.f32 %v308_v28, %v299_v18  ;;  %v313_v33 = vadd.f32 %v308_v28, %v300_v19 }
 0x219   :  { %v314_v34 = vadd.f32 %v308_v28, %v301_v20  ;;  %v315_v35 = vadd.f32 %v308_v28, %v302_v26 }
 0x21a   :  { %v316_v37 = vmax.f32 %v310_v29, 0.0  ;;  %v317_v38 = vmax.f32 %v311_v30, 0.0  ;;  %v318_v39 = vmax.f32 %v312_v32, 0.0  ;;  %v319_v40 = vmax.f32 %v313_v33, 0.0 }
 0x21b   :  { %v320_v41 = vmax.f32 %v314_v34, 0.0  ;;  %v321_v24 = vmax.f32 %v315_v35, 0.0 }
 0x21c   :  { %v322_v27 = vmul.f32 %v316_v37, %v479_v21  ;;  %v323_v31 = vmul.f32 %v317_v38, %v481_v22  ;;  %v324_v36 = vmul.f32 %v318_v39, %v483_v23  ;;  %v325_v42 = vmul.f32 %v319_v40, %v487_v25 }
 0x21d   :  { %v326_v44 = vmul.f32 %v320_v41, %v495_v43  ;;  %v327_v45 = vmul.f32 %v321_v24, %v497_v46 }
 0x21e   :  { %v380_v47 = vpack.c.bf16 %v323_v31, %v322_v27  ;;  %v381_v48 = vpack.c.bf16 %v325_v42, %v324_v36 }
 0x21f   :  { %v382_v49 = vpack.c.bf16 %v327_v45, %v326_v44 }
 0x220   :  { %352 = vst [vmem:[%s528_s5] sm:$0xff] %v380_v47  ;;  %353 = vst [vmem:[%s528_s5 + $0x8] sm:$0xff] %v381_v48 }
 0x221   :  { %357 = vst.msk [vmem:[%s528_s5 + $0x10] sm:$0xff] %vm356_vm4, %v382_v49 }

// kernel: bottleneck_forward.5
= control target key start
LH: loop header
LB: loop body
LE: loop exit
PB: predicated region body
PF: predicated region fallthrough
CT: control target
= control target key end

     0   :  { %vm63_vm0 = vcmask 1043456   ;;  %v659_v3 = vmov 0   ;;  %vm56_vm1 = vcmask 64512   ;;  %v251_v15 = vlaneseq  ;;  %s1062_s0 = inlined_call_operand.vmem [shape: bf16[8,648], index: 0, kind: input, shape index: {}]   ;;  %s1063_s1 = inlined_call_operand.vmem [shape: bf16[32,8], index: 1, kind: input, shape index: {}]   ;;  %s1064_s2 = inlined_call_operand.vmem [shape: f32[1,648], index: 2, kind: input, shape index: {}]   ;;  %s1065_s3 = inlined_call_operand.vmem [shape: f32[32,1], index: 3, kind: input, shape index: {}]   ;;  %s1066_s4 = inlined_call_operand.vmem [shape: f32[32,1], index: 4, kind: input, shape index: {}]   ;;  %s1067_s5 = inlined_call_operand.vmem [shape: f32[32,648], index: 5, kind: input, shape index: {}]   ;;  %s1068_s6 = inlined_call_operand.vmem [shape: f32[32,648], index: 6, kind: output, shape index: {}]  }
   0x1   :  { %v28_v0 = vld [vmem:[%s1062_s0] sm:$0xff]  ;;  %v29_v1 = vld [vmem:[%s1062_s0 + $0x8] sm:$0xff]  ;;  %v30_v2 = vld [vmem:[%s1062_s0 + $0x10] sm:$0xff]  ;;  %114 = vmatprep.mubr.bf16.mxu0 %v659_v3  ;;  %124 = vmatprep.mubr.bf16.mxu1 %v659_v3 }
   0x2   :  { %v624_v4 = vcombine.high %v28_v0, %v28_v0  ;;  %v623_v5 = vcombine.low %v28_v0, %v28_v0  ;;  %v626_v6 = vcombine.high %v29_v1, %v29_v1  ;;  %v625_v7 = vcombine.low %v29_v1, %v29_v1  ;;  %642 = vset.pattern.permute.xlu1 %v659_v3  ;;  %v645_v11 = vld [vmem:[%s1063_s1] sm:$0xff]   ;;  %v646_v12 = vld [vmem:[%s1063_s1 + $0x8] sm:$0xff]  }
   0x3   :  { %v628_v8 = vcombine.high %v30_v2, %v30_v2  ;;  %v627_v9 = vcombine.low %v30_v2, %v30_v2  ;;  %641 = vset.pattern.permute.xlu0 %v659_v3  ;;  %v252_v16 = vshrl.u32 %v251_v15, 7  ;;  %v241_v18 = vld [vmem:[%s1064_s2] sm:$0x3f] }
   0x4   :  { %629 = vmatprep.subr.msk.bf16.mxu0 %vm63_vm0, %v624_v4  ;;  %638 = vmatprep.subr.msk.bf16.mxu1 %vm63_vm0, %v624_v4  ;;  %v65_v10 = vsel %vm63_vm0, %v623_v5, 0  ;;  %v71_v13 = vsel %vm63_vm0, %v625_v7, 0 }
   0x5   :  { %83 = vmatpush1.bf16.msra.mxu0 %v65_v10  ;;  %639 = vmatpush1.bf16.msra.mxu1 %v65_v10  ;;  %v77_v14 = vsel %vm63_vm0, %v627_v9, 0  ;;  %v253_v17 = vsub.s32 0, %v252_v16  ;;  %v257_v19 = vsub.s32 1, %v252_v16  ;;  %v261_v21 = vsub.s32 2, %v252_v16 }
   0x6   :  { %632 = vmatprep.subr.msk.bf16.mxu1 %vm63_vm0, %v626_v6  ;;  %635 = vmatprep.subr.msk.bf16.mxu0 %vm63_vm0, %v628_v8  ;;  %v265_v23 = vsub.s32 3, %v252_v16  ;;  %v269_v31 = vsub.s32 4, %v252_v16  ;;  %v273_v37 = vsub.s32 5, %v252_v16 }
   0x7   :  { %v254_v20 = vrot.slane %v241_v18, %v253_v17  ;;  %v258_v22 = vrot.slane %v241_v18, %v257_v19  ;;  %v736_v30 = vrot.slane %v241_v18, %v261_v21 }
   0x8   :  { %630 = vmatmul.mubr.msk.bf16.vlgmr.msra.gmra.mrb[0].mxu0 %vm56_vm1, %v645_v11  ;;  %631 = vmatmul.mubr.msk.bf16.vlgmr.msra.gmra.mrb[0].mxu1 %vm56_vm1, %v646_v12  ;;  %v744_v36 = vrot.slane %v241_v18, %v265_v23  ;;  %v764_v54 = vrot.slane %v241_v18, %v269_v31  ;;  %v766_v55 = vrot.slane %v241_v18, %v273_v37 }
   0x9   :  { %136 = vmatpush1.bf16.msra.mxu1 %v71_v13  ;;  %189 = vmatpush1.bf16.msra.mxu0 %v77_v14 }
   0xa   :  { %167 = vmatprep.mubr.bf16.mxu1 %v659_v3  ;;  %220 = vmatprep.mubr.bf16.mxu0 %v659_v3 }
  0x10   :  { %633 = vmatmul.mubr.msk.bf16.vlgmr.msra.gmra.mrb[4].mxu1 %vm56_vm1, %v645_v11  ;;  %636 = vmatmul.mubr.msk.bf16.vlgmr.msra.gmra.mrb[4].mxu0 %vm56_vm1, %v645_v11 }
  0x11   :  { %177 = vmatprep.mubr.bf16.mxu1 %v659_v3  ;;  %230 = vmatprep.mubr.bf16.mxu0 %v659_v3 }
  0x18   :  { %634 = vmatmul.mubr.msk.bf16.gmra.mrb[8].mxu1 %vm56_vm1, %v646_v12  ;;  %637 = vmatmul.mubr.msk.bf16.gmra.mrb[8].mxu0 %vm56_vm1, %v646_v12 }
  0xdb   :  { %v726_v24 = vpop.f32.mrb[0].mxu0  ;;  %v728_v25 = vpop.f32.mrb[0].mxu1 }
  0xdc   :  { %v281_v26 = vmul.f32 %v254_v20, %v726_v24  ;;  %v293_v27 = vmul.f32 %v254_v20, %v728_v25  ;;  %v732_v28 = vpop.f32.mrb[1].mxu0  ;;  %v734_v29 = vpop.f32.mrb[1].mxu1 }
  0xdd   :  { %v282_v32 = vmul.f32 %v258_v22, %v732_v28  ;;  %v294_v33 = vmul.f32 %v258_v22, %v734_v29  ;;  %v740_v34 = vpop.f32.mrb[2].mxu0  ;;  %v742_v35 = vpop.f32.mrb[2].mxu1 }
  0xde   :  { %v337_v38 = vmul.f32 %v281_v26, %v726_v24  ;;  %v349_v39 = vmul.f32 %v293_v27, %v728_v25  ;;  %v287_v40 = vmul.f32 %v254_v20, %v740_v34  ;;  %v299_v41 = vmul.f32 %v254_v20, %v742_v35  ;;  %v750_v42 = vpop.f32.mrb[3].mxu0  ;;  %v752_v43 = vpop.f32.mrb[3].mxu1 }
  0xdf   :  { %v305_v44 = vadd.f32 %v282_v32, %v281_v26  ;;  %v338_v45 = vmul.f32 %v282_v32, %v732_v28  ;;  %v755_v46 = vadd.f32 %v294_v33, %v293_v27  ;;  %v350_v47 = vmul.f32 %v294_v33, %v734_v29 }
  0xe0   :  { %v343_v48 = vmul.f32 %v287_v40, %v740_v34  ;;  %v355_v49 = vmul.f32 %v299_v41, %v742_v35  ;;  %v288_v50 = vmul.f32 %v258_v22, %v750_v42  ;;  %v300_v51 = vmul.f32 %v258_v22, %v752_v43 }
  0xe1   :  { %v361_v52 = vadd.f32 %v338_v45, %v337_v38  ;;  %v762_v53 = vadd.f32 %v350_v47, %v349_v39 }
  0xe2   :  { %v313_v56 = vadd.f32 %v288_v50, %v287_v40  ;;  %v344_v57 = vmul.f32 %v288_v50, %v750_v42  ;;  %v769_v58 = vadd.f32 %v300_v51, %v299_v41  ;;  %v356_v59 = vmul.f32 %v300_v51, %v752_v43 }
  0xe3   :  { %v772_v60 = vpop.f32.mrb[4].mxu1  ;;  %v774_v61 = vpop.f32.mrb[4].mxu0 }
  0xe4   :  { %v369_v62 = vadd.f32 %v344_v57, %v343_v48  ;;  %v776_v63 = vadd.f32 %v356_v59, %v355_v49  ;;  %v283_v0 = vmul.f32 %v736_v30, %v772_v60  ;;  %v780_v1 = vpop.f32.mrb[5].mxu1  ;;  %v782_v2 = vpop.f32.mrb[5].mxu0  ;;  %v285_v3 = vmul.f32 %v764_v54, %v774_v61 }
  0xe5   :  { %v284_v4 = vmul.f32 %v744_v36, %v780_v1  ;;  %v788_v5 = vpop.f32.mrb[6].mxu1  ;;  %v790_v6 = vpop.f32.mrb[6].mxu0  ;;  %v286_v12 = vmul.f32 %v766_v55, %v782_v2 }
  0xe6   :  { %v306_v7 = vadd.f32 %v305_v44, %v283_v0  ;;  %v339_v8 = vmul.f32 %v283_v0, %v772_v60  ;;  %v289_v9 = vmul.f32 %v736_v30, %v788_v5  ;;  %v795_v10 = vpop.f32.mrb[7].mxu1  ;;  %v797_v11 = vpop.f32.mrb[7].mxu0  ;;  %v291_v14 = vmul.f32 %v764_v54, %v790_v6 }
  0xe7   :  { %v340_v13 = vmul.f32 %v284_v4, %v780_v1  ;;  %v290_v15 = vmul.f32 %v744_v36, %v795_v10  ;;  %v292_v16 = vmul.f32 %v766_v55, %v797_v11  ;;  %v341_v21 = vmul.f32 %v285_v3, %v774_v61 }
  0xe8   :  { %v362_v17 = vadd.f32 %v361_v52, %v339_v8  ;;  %v314_v18 = vadd.f32 %v313_v56, %v289_v9  ;;  %v345_v19 = vmul.f32 %v289_v9, %v788_v5  ;;  %v307_v20 = vadd.f32 %v306_v7, %v284_v4 }
  0xe9   :  { %v346_v22 = vmul.f32 %v290_v15, %v795_v10  ;;  %v309_v23 = vsel %vm56_vm1, %v286_v12, 0.0  ;;  %v348_v26 = vmul.f32 %v292_v16, %v797_v11  ;;  %v347_v31 = vmul.f32 %v291_v14, %v790_v6 }
  0xea   :  { %v370_v27 = vadd.f32 %v369_v62, %v345_v19  ;;  %v308_v32 = vadd.f32 %v307_v20, %v285_v3  ;;  %v315_v33 = vadd.f32 %v314_v18, %v290_v15  ;;  %v317_v40 = vsel %vm56_vm1, %v292_v16, 0.0 }
  0xeb   :  { %v814_v37 = vpop.f32.mrb[8].mxu1  ;;  %v816_v38 = vpop.f32.mrb[8].mxu0  ;;  %v373_v39 = vsel %vm56_vm1, %v348_v26, 0.0  ;;  %v342_v41 = vmul.f32 %v286_v12, %v782_v2  ;;  %v363_v44 = vadd.f32 %v362_v17, %v340_v13 }
  0xec   :  { %v295_v45 = vmul.f32 %v736_v30, %v814_v37  ;;  %v823_v47 = vpop.f32.mrb[9].mxu1  ;;  %v310_v48 = vadd.f32 %v309_v23, %v308_v32  ;;  %v297_v49 = vmul.f32 %v764_v54, %v816_v38  ;;  %v827_v50 = vpop.f32.mrb[9].mxu0  ;;  %v371_v51 = vadd.f32 %v370_v27, %v346_v22 }
  0xed   :  { %v296_v52 = vmul.f32 %v744_v36, %v823_v47  ;;  %v831_v56 = vpop.f32.mrb[10].mxu1  ;;  %v298_v57 = vmul.f32 %v766_v55, %v827_v50  ;;  %v835_v59 = vpop.f32.mrb[10].mxu0  ;;  %v316_v62 = vadd.f32 %v315_v33, %v291_v14  ;;  %v364_v0 = vadd.f32 %v363_v44, %v341_v21 }
  0xee   :  { %v322_v3 = vadd.f32 %v755_v46, %v295_v45  ;;  %v351_v4 = vmul.f32 %v295_v45, %v814_v37  ;;  %v301_v7 = vmul.f32 %v736_v30, %v831_v56  ;;  %311 = vadd.xlane.f32.xlu0 %v310_v48  ;;  %v841_v8 = vpop.f32.mrb[11].mxu1  ;;  %v353_v9 = vmul.f32 %v297_v49, %v816_v38  ;;  %v844_v12 = vpop.f32.mrb[11].mxu0 }
  0xef   :  { %v352_v13 = vmul.f32 %v296_v52, %v823_v47  ;;  %v302_v14 = vmul.f32 %v744_v36, %v841_v8  ;;  %v354_v15 = vmul.f32 %v298_v57, %v827_v50  ;;  %v303_v46 = vmul.f32 %v764_v54, %v835_v59 }
  0xf0   :  { %v378_v16 = vadd.f32 %v762_v53, %v351_v4  ;;  %v330_v30 = vadd.f32 %v769_v58, %v301_v7  ;;  %v357_v17 = vmul.f32 %v301_v7, %v831_v56  ;;  %v372_v18 = vadd.f32 %v371_v51, %v347_v31 }
  0xf1   :  { %v358_v19 = vmul.f32 %v302_v14, %v841_v8  ;;  %v359_v20 = vmul.f32 %v303_v46, %v835_v59  ;;  %v318_v21 = vadd.f32 %v317_v40, %v316_v62  ;;  %v304_v36 = vmul.f32 %v766_v55, %v844_v12 }
  0xf2   :  { %v386_v22 = vadd.f32 %v776_v63, %v357_v17  ;;  %v331_v23 = vadd.f32 %v330_v30, %v302_v14  ;;  %v374_v26 = vadd.f32 %v373_v39, %v372_v18  ;;  %v365_v54 = vsel %vm56_vm1, %v342_v41, 0.0 }
  0xf3   :  { %319 = vadd.xlane.f32.xlu0 %v318_v21  ;;  %v360_v53 = vmul.f32 %v304_v36, %v844_v12  ;;  %v366_v58 = vadd.f32 %v365_v54, %v364_v0  ;;  %v323_v27 = vadd.f32 %v322_v3, %v296_v52  ;;  %v325_v32 = vsel %vm56_vm1, %v298_v57, 0.0 }
  0xf4   :  { %v387_v31 = vadd.f32 %v386_v22, %v358_v19  ;;  %375 = vadd.xlane.f32.xlu1 %v374_v26  ;;  %v379_v33 = vadd.f32 %v378_v16, %v352_v13  ;;  %v332_v40 = vadd.f32 %v331_v23, %v303_v46  ;;  %v381_v55 = vsel %vm56_vm1, %v354_v15, 0.0 }
  0xf5   :  { %v324_v44 = vadd.f32 %v323_v27, %v297_v49  ;;  %v333_v63 = vsel %vm56_vm1, %v304_v36, 0.0  ;;  %v389_v39 = vsel %vm56_vm1, %v360_v53, 0.0 }
  0xf6   :  { %v380_v45 = vadd.f32 %v379_v33, %v353_v9  ;;  %v334_v41 = vadd.f32 %v333_v63, %v332_v40  ;;  %v388_v48 = vadd.f32 %v387_v31, %v359_v20  ;;  %v243_v40 = vld [vmem:[%s1065_s3 + $0x8] sm:$0xff] }
  0xf7   :  { %367 = vadd.xlane.f32.xlu0 %v366_v58  ;;  %v326_v51 = vadd.f32 %v325_v32, %v324_v44 }
  0xf8   :  { %v382_v62 = vadd.f32 %v381_v55, %v380_v45  ;;  %v390_v52 = vadd.f32 %v389_v39, %v388_v48  ;;  %v242_v39 = vld [vmem:[%s1065_s3] sm:$0xff] }
  0xf9   :  { %327 = vadd.xlane.f32.xlu1 %v326_v51 }
  0xfb   :  { %383 = vadd.xlane.f32.xlu0 %v382_v62  ;;  %v246_v62 = vld [vmem:[%s1066_s4] sm:$0xff] }
  0xfd   :  { %335 = vadd.xlane.f32.xlu1 %v334_v41 }
 0x101   :  { %391 = vadd.xlane.f32.xlu1 %v390_v52 }
 0x17b   :  { %v312_v57 = vpop.xlane.xlu0 %311 }
 0x17c   :  { %v393_v49 = vmul.f32 0.001953125, %v312_v57 }
 0x17e   :  { %v401_v15 = vmul.f32 %v393_v49, %v393_v49 }
 0x180   :  { %v320_v0 = vpop.xlane.xlu0 %319 }
 0x181   :  { %v376_v3 = vpop.xlane.xlu1 %375  ;;  %v394_v4 = vmul.f32 0.001953125, %v320_v0 }
 0x182   :  { %v398_v7 = vmul.f32 0.001953125, %v376_v3  ;;  %v247_v3 = vld [vmem:[%s1066_s4 + $0x8] sm:$0xff] }
 0x183   :  { %v402_v13 = vmul.f32 %v394_v4, %v394_v4 }
 0x184   :  { %v368_v14 = vpop.xlane.xlu0 %367 }
 0x185   :  { %v406_v9 = vsub.f32 %v398_v7, %v402_v13  ;;  %v397_v46 = vmul.f32 0.001953125, %v368_v14  ;;  %v244_v14 = vld [vmem:[%s1065_s3 + $0x10] sm:$0xff] }
 0x186   :  { %v328_v16 = vpop.xlane.xlu1 %327 }
 0x187   :  { %v410_v30 = vmax.f32 %v406_v9, 0.0  ;;  %v405_v17 = vsub.f32 %v397_v46, %v401_v15  ;;  %v395_v18 = vmul.f32 0.001953125, %v328_v16  ;;  %v248_v16 = vld [vmem:[%s1066_s4 + $0x10] sm:$0xff] }
 0x188   :  { %v384_v19 = vpop.xlane.xlu0 %383 }
 0x189   :  { %v414_v20 = vadd.f32 1e-05, %v410_v30  ;;  %v409_v21 = vmax.f32 %v405_v17, 0.0  ;;  %v403_v36 = vmul.f32 %v395_v18, %v395_v18  ;;  %v399_v22 = vmul.f32 0.001953125, %v384_v19  ;;  %v249_v19 = vld [vmem:[%s1066_s4 + $0x18] sm:$0xff] }
 0x18a   :  { %v336_v23 = vpop.xlane.xlu1 %335 }
 0x18b   :  { %651 = vrsqrt.f32 %v414_v20  ;;  %v413_v26 = vadd.f32 1e-05, %v409_v21  ;;  %v407_v54 = vsub.f32 %v399_v22, %v403_v36  ;;  %v396_v53 = vmul.f32 0.001953125, %v336_v23 }
 0x18d   :  { %653 = vrsqrt.f32 %v413_v26  ;;  %v411_v27 = vmax.f32 %v407_v54, 0.0  ;;  %v404_v31 = vmul.f32 %v396_v53, %v396_v53  ;;  %v521_v54 = vld [vmem:[%s1067_s5] sm:$0xff] }
 0x18e   :  { %v392_v58 = vpop.xlane.xlu1 %391 }
 0x18f   :  { %v400_v32 = vmul.f32 0.001953125, %v392_v58  ;;  %v415_v44 = vadd.f32 1e-05, %v411_v27 }
 0x191   :  { %v408_v33 = vsub.f32 %v400_v32, %v404_v31  ;;  %655 = vrsqrt.f32 %v415_v44 }
 0x193   :  { %v412_v55 = vmax.f32 %v408_v33, 0.0 }
 0x195   :  { %v652_v63 = vpop.eup %651  ;;  %v416_v48 = vadd.f32 1e-05, %v412_v55 }
 0x196   :  { %v422_v45 = vmul.f32 %v652_v63, %v243_v40 }
 0x197   :  { %v654_v41 = vpop.eup %653  ;;  %657 = vrsqrt.f32 %v416_v48 }
 0x198   :  { %432 = vperm.xlu1 %642, %v422_v45   ;;  %v421_v51 = vmul.f32 %v654_v41, %v242_v39  ;;  %v470_v57 = vmul.f32 %v422_v45, %v394_v4 }
 0x19a   :  { %427 = vperm.xlu0 %641, %v421_v51   ;;  %v469_v52 = vmul.f32 %v421_v51, %v393_v49  ;;  %v474_v7 = vsub.f32 %v247_v3, %v470_v57  ;;  %v245_v49 = vld [vmem:[%s1065_s3 + $0x18] sm:$0xff] }
 0x19b   :  { %v656_v13 = vpop.eup %655 }
 0x19c   :  { %v473_v0 = vsub.f32 %v246_v62, %v469_v52  ;;  %v423_v15 = vmul.f32 %v656_v13, %v244_v14  ;;  %v528_v14 = vld [vmem:[%s1067_s5 + $0x38] sm:$0xff] }
 0x19e   :  { %479 = vperm.xlu1 %642, %v473_v0   ;;  %v471_v46 = vmul.f32 %v423_v15, %v395_v18  ;;  %v527_v0 = vld [vmem:[%s1067_s5 + $0x30] sm:$0xff] }
 0x1a0   :  { %v475_v30 = vsub.f32 %v248_v16, %v471_v46 }
 0x1a1   :  { %v658_v9 = vpop.eup %657 }
 0x1a2   :  { %484 = vperm.xlu1 %642, %v474_v7   ;;  %v424_v4 = vmul.f32 %v658_v9, %v245_v49  ;;  %v530_v9 = vld [vmem:[%s1067_s5 + $0x48] sm:$0xff]  ;;  %v531_v49 = vld [vmem:[%s1067_s5 + $0x50] sm:$0xff] }
 0x1a4   :  { %v472_v17 = vmul.f32 %v424_v4, %v396_v53 }
 0x1a6   :  { %437 = vperm.xlu1 %642, %v423_v15   ;;  %v476_v20 = vsub.f32 %v249_v19, %v472_v17 }
 0x1aa   :  { %442 = vperm.xlu1 %642, %v424_v4   ;;  %v532_v4 = vld [vmem:[%s1067_s5 + $0x58] sm:$0xff] }
 0x1ae   :  { %489 = vperm.xlu1 %642, %v475_v30  }
 0x1b2   :  { %494 = vperm.xlu1 %642, %v476_v20  }
 0x217   :  { %v433_v21 = vpop.permute.xlu1 %432 }
 0x218   :  { %v451_v53 = vmul.f32 %v433_v21, %v740_v34  ;;  %v452_v58 = vmul.f32 %v433_v21, %v750_v42  ;;  %v525_v34 = vld [vmem:[%s1067_s5 + $0x20] sm:$0xff]  ;;  %v526_v42 = vld [vmem:[%s1067_s5 + $0x28] sm:$0xff]  ;;  %v453_v40 = vmul.f32 %v433_v21, %v788_v5  ;;  %v454_v44 = vmul.f32 %v433_v21, %v795_v10 }
 0x219   :  { %v428_v36 = vpop.permute.xlu0 %427  ;;  %v455_v51 = vmul.f32 %v433_v21, %v790_v6  ;;  %v456_v62 = vmul.f32 %v433_v21, %v797_v11  ;;  %v529_v6 = vld [vmem:[%s1067_s5 + $0x40] sm:$0xff] }
 0x21a   :  { %v445_v22 = vmul.f32 %v428_v36, %v726_v24  ;;  %v446_v18 = vmul.f32 %v428_v36, %v732_v28  ;;  %v447_v23 = vmul.f32 %v428_v36, %v772_v60  ;;  %v448_v26 = vmul.f32 %v428_v36, %v780_v1  ;;  %v522_v24 = vld [vmem:[%s1067_s5 + $0x8] sm:$0xff]  ;;  %v523_v28 = vld [vmem:[%s1067_s5 + $0x10] sm:$0xff]  ;;  %v524_v60 = vld [vmem:[%s1067_s5 + $0x18] sm:$0xff] }
 0x21b   :  { %v449_v27 = vmul.f32 %v428_v36, %v774_v61  ;;  %v450_v31 = vmul.f32 %v428_v36, %v782_v2 }
 0x21d   :  { %v480_v1 = vpop.permute.xlu1 %479 }
 0x21e   :  { %v497_v61 = vadd.f32 %v480_v1, %v445_v22  ;;  %v498_v2 = vadd.f32 %v480_v1, %v446_v18  ;;  %v499_v32 = vadd.f32 %v480_v1, %v447_v23  ;;  %v500_v33 = vadd.f32 %v480_v1, %v448_v26 }
 0x21f   :  { %v501_v55 = vadd.f32 %v480_v1, %v449_v27  ;;  %v502_v63 = vadd.f32 %v480_v1, %v450_v31 }
 0x220   :  { %v545_v39 = vadd.f32 %v521_v54, %v497_v61  ;;  %v546_v45 = vadd.f32 %v522_v24, %v498_v2  ;;  %v547_v41 = vadd.f32 %v523_v28, %v499_v32  ;;  %v548_v48 = vadd.f32 %v524_v60, %v500_v33  ;;  %v533_v2 = vld [vmem:[%s1067_s5 + $0x60] sm:$0xff] }
 0x221   :  { %v549_v52 = vadd.f32 %v525_v34, %v501_v55  ;;  %v550_v57 = vadd.f32 %v526_v42, %v502_v63  ;;  %v485_v3 = vpop.permute.xlu1 %484 }
 0x222   :  { %v569_v5 = vmax.f32 %v545_v39, 0.0  ;;  %v570_v7 = vmax.f32 %v546_v45, 0.0  ;;  %v571_v10 = vmax.f32 %v547_v41, 0.0  ;;  %v572_v13 = vmax.f32 %v548_v48, 0.0 }
 0x223   :  { %v573_v11 = vmax.f32 %v549_v52, 0.0  ;;  %v574_v15 = vmax.f32 %v550_v57, 0.0  ;;  %v503_v46 = vadd.f32 %v485_v3, %v451_v53  ;;  %v504_v16 = vadd.f32 %v485_v3, %v452_v58 }
 0x224   :  { %593 = vst [vmem:[%s1068_s6] sm:$0xff] %v569_v5  ;;  %594 = vst [vmem:[%s1068_s6 + $0x8] sm:$0xff] %v570_v7  ;;  %v505_v30 = vadd.f32 %v485_v3, %v453_v40  ;;  %v506_v17 = vadd.f32 %v485_v3, %v454_v44  ;;  %v507_v19 = vadd.f32 %v485_v3, %v455_v51  ;;  %v534_v40 = vld [vmem:[%s1067_s5 + $0x68] sm:$0xff] }
 0x225   :  { %595 = vst [vmem:[%s1068_s6 + $0x10] sm:$0xff] %v571_v10  ;;  %596 = vst [vmem:[%s1068_s6 + $0x18] sm:$0xff] %v572_v13  ;;  %v508_v20 = vadd.f32 %v485_v3, %v456_v62  ;;  %v551_v21 = vadd.f32 %v527_v0, %v503_v46  ;;  %v552_v36 = vadd.f32 %v528_v14, %v504_v16  ;;  %v438_v22 = vpop.permute.xlu1 %437  ;;  %v539_v10 = vld [vmem:[%s1067_s5 + $0x90] sm:$0xff] }
 0x226   :  { %597 = vst [vmem:[%s1068_s6 + $0x20] sm:$0xff] %v573_v11  ;;  %598 = vst.msk [vmem:[%s1068_s6 + $0x28] sm:$0xff] %vm56_vm1, %v574_v15  ;;  %v553_v18 = vadd.f32 %v529_v6, %v505_v30  ;;  %v554_v23 = vadd.f32 %v530_v9, %v506_v17  ;;  %v555_v26 = vadd.f32 %v531_v49, %v507_v19  ;;  %v541_v15 = vld [vmem:[%s1067_s5 + $0xa0] sm:$0xff]  ;;  %v543_v49 = vld [vmem:[%s1067_s5 + $0xb0] sm:$0xff] }
 0x227   :  { %v556_v54 = vadd.f32 %v532_v4, %v508_v20  ;;  %v575_v53 = vmax.f32 %v551_v21, 0.0  ;;  %v576_v58 = vmax.f32 %v552_v36, 0.0  ;;  %v457_v1 = vmul.f32 %v438_v22, %v728_v25  ;;  %v535_v25 = vld [vmem:[%s1067_s5 + $0x70] sm:$0xff]  ;;  %v544_v4 = vld [vmem:[%s1067_s5 + $0xb8] sm:$0xff] }
 0x228   :  { %v577_v27 = vmax.f32 %v553_v18, 0.0  ;;  %v578_v31 = vmax.f32 %v554_v23, 0.0  ;;  %v579_v24 = vmax.f32 %v555_v26, 0.0  ;;  %v458_v34 = vmul.f32 %v438_v22, %v734_v29  ;;  %v536_v29 = vld [vmem:[%s1067_s5 + $0x78] sm:$0xff] }
 0x229   :  { %v580_v28 = vmax.f32 %v556_v54, 0.0  ;;  %599 = vst [vmem:[%s1068_s6 + $0x30] sm:$0xff] %v575_v53  ;;  %600 = vst [vmem:[%s1068_s6 + $0x38] sm:$0xff] %v576_v58  ;;  %v443_v60 = vpop.permute.xlu1 %442  ;;  %v459_v42 = vmul.f32 %v438_v22, %v814_v37  ;;  %v460_v61 = vmul.f32 %v438_v22, %v823_v47  ;;  %v461_v32 = vmul.f32 %v438_v22, %v816_v38  ;;  %v537_v38 = vld [vmem:[%s1067_s5 + $0x80] sm:$0xff] }
 0x22a   :  { %601 = vst [vmem:[%s1068_s6 + $0x40] sm:$0xff] %v577_v27  ;;  %602 = vst [vmem:[%s1068_s6 + $0x48] sm:$0xff] %v578_v31  ;;  %v462_v33 = vmul.f32 %v438_v22, %v827_v50  ;;  %v463_v47 = vmul.f32 %v443_v60, %v742_v35  ;;  %v464_v44 = vmul.f32 %v443_v60, %v752_v43  ;;  %v538_v50 = vld [vmem:[%s1067_s5 + $0x88] sm:$0xff] }
 0x22b   :  { %603 = vst [vmem:[%s1068_s6 + $0x50] sm:$0xff] %v579_v24  ;;  %604 = vst.msk [vmem:[%s1068_s6 + $0x58] sm:$0xff] %vm56_vm1, %v580_v28  ;;  %v465_v51 = vmul.f32 %v443_v60, %v831_v56  ;;  %v466_v35 = vmul.f32 %v443_v60, %v841_v8  ;;  %v467_v5 = vmul.f32 %v443_v60, %v835_v59  ;;  %v540_v8 = vld [vmem:[%s1067_s5 + $0x98] sm:$0xff] }
 0x22c   :  { %v468_v7 = vmul.f32 %v443_v60, %v844_v12  ;;  %v542_v12 = vld [vmem:[%s1067_s5 + $0xa8] sm:$0xff] }
 0x22d   :  { %v490_v37 = vpop.permute.xlu1 %489 }
 0x22e   :  { %v509_v55 = vadd.f32 %v490_v37, %v457_v1  ;;  %v510_v63 = vadd.f32 %v490_v37, %v458_v34  ;;  %v511_v39 = vadd.f32 %v490_v37, %v459_v42  ;;  %v512_v45 = vadd.f32 %v490_v37, %v460_v61 }
 0x22f   :  { %v513_v41 = vadd.f32 %v490_v37, %v461_v32  ;;  %v514_v48 = vadd.f32 %v490_v37, %v462_v33 }
 0x230   :  { %v557_v62 = vadd.f32 %v533_v2, %v509_v55  ;;  %v558_v43 = vadd.f32 %v534_v40, %v510_v63  ;;  %v559_v52 = vadd.f32 %v535_v25, %v511_v39  ;;  %v560_v57 = vadd.f32 %v536_v29, %v512_v45 }
 0x231   :  { %v561_v0 = vadd.f32 %v537_v38, %v513_v41  ;;  %v562_v3 = vadd.f32 %v538_v50, %v514_v48  ;;  %v495_v13 = vpop.permute.xlu1 %494 }
 0x232   :  { %v581_v14 = vmax.f32 %v557_v62, 0.0  ;;  %v582_v6 = vmax.f32 %v558_v43, 0.0  ;;  %v583_v56 = vmax.f32 %v559_v52, 0.0  ;;  %v584_v11 = vmax.f32 %v560_v57, 0.0 }
 0x233   :  { %v585_v59 = vmax.f32 %v561_v0, 0.0  ;;  %v586_v9 = vmax.f32 %v562_v3, 0.0  ;;  %v515_v46 = vadd.f32 %v495_v13, %v463_v47  ;;  %v516_v16 = vadd.f32 %v495_v13, %v464_v44 }
 0x234   :  { %605 = vst [vmem:[%s1068_s6 + $0x60] sm:$0xff] %v581_v14  ;;  %606 = vst [vmem:[%s1068_s6 + $0x68] sm:$0xff] %v582_v6  ;;  %v517_v30 = vadd.f32 %v495_v13, %v465_v51  ;;  %v518_v17 = vadd.f32 %v495_v13, %v466_v35  ;;  %v519_v19 = vadd.f32 %v495_v13, %v467_v5 }
 0x235   :  { %607 = vst [vmem:[%s1068_s6 + $0x70] sm:$0xff] %v583_v56  ;;  %608 = vst [vmem:[%s1068_s6 + $0x78] sm:$0xff] %v584_v11  ;;  %v520_v20 = vadd.f32 %v495_v13, %v468_v7  ;;  %v563_v21 = vadd.f32 %v539_v10, %v515_v46  ;;  %v564_v36 = vadd.f32 %v540_v8, %v516_v16 }
 0x236   :  { %609 = vst [vmem:[%s1068_s6 + $0x80] sm:$0xff] %v585_v59  ;;  %610 = vst.msk [vmem:[%s1068_s6 + $0x88] sm:$0xff] %vm56_vm1, %v586_v9  ;;  %v565_v22 = vadd.f32 %v541_v15, %v517_v30  ;;  %v566_v18 = vadd.f32 %v542_v12, %v518_v17  ;;  %v567_v23 = vadd.f32 %v543_v49, %v519_v19 }
 0x237   :  { %v568_v26 = vadd.f32 %v544_v4, %v520_v20  ;;  %v587_v54 = vmax.f32 %v563_v21, 0.0  ;;  %v588_v53 = vmax.f32 %v564_v36, 0.0 }
 0x238   :  { %v589_v58 = vmax.f32 %v565_v22, 0.0  ;;  %v590_v27 = vmax.f32 %v566_v18, 0.0  ;;  %v591_v31 = vmax.f32 %v567_v23, 0.0 }
 0x239   :  { %v592_v24 = vmax.f32 %v568_v26, 0.0  ;;  %611 = vst [vmem:[%s1068_s6 + $0x90] sm:$0xff] %v587_v54  ;;  %612 = vst [vmem:[%s1068_s6 + $0x98] sm:$0xff] %v588_v53 }
 0x23a   :  { %613 = vst [vmem:[%s1068_s6 + $0xa0] sm:$0xff] %v589_v58  ;;  %614 = vst [vmem:[%s1068_s6 + $0xa8] sm:$0xff] %v590_v27 }
 0x23b   :  { %615 = vst [vmem:[%s1068_s6 + $0xb0] sm:$0xff] %v591_v31  ;;  %616 = vst.msk [vmem:[%s1068_s6 + $0xb8] sm:$0xff] %vm56_vm1, %v592_v24 }

</bundles_post_ra>
